<compile_context>
chip_gen: v7x
topology: tpu7x:2x2x1
jax: 0.10.0
libtpu: 0.0.40
codegen_flags: <defaults>
</compile_context>

<pallas_src>
import functools
import math

import jax
import jax.numpy as jnp
from jax.experimental import pallas as pl
from jax.experimental.pallas import tpu as pltpu

EPSILON = 1e-5            # junmai.layers.EPSILON
CUTOFF_LOWER = 0.0        # ExpNormalSmearing defaults
CUTOFF_UPPER = 5.0


def _round_up(v, m):
    return (v + m - 1) // m * m


# ----------------------------------------------------------------------------
# Kernel 1: per-particle JunmaiLayer summary  y[i, :] = fc_summary(x_att[i, :])
# Grid: tiles of i rows; all N neighbours handled per step.
# ----------------------------------------------------------------------------
def _summary_kernel(x_i_ref, x_t_ref, rhs_ref, kq_i_ref, means_ref, betas_ref,
                    w1_ref, b1_ref, w2_ref, b2_ref, out_ref, *, alpha, num_rbf):
    R = num_rbf
    H2 = kq_i_ref.shape[1] // R          # 2*hidden_features (K|Q concatenated)
    H = H2 // 2
    TI = x_i_ref.shape[0]

    x_i = x_i_ref[...]                   # (TI, 3)
    x_t = x_t_ref[...]                   # (3, N)

    # pairwise displacement components, (TI, N) each — N on the lane axis
    dx = x_i[:, 0:1] - x_t[0:1, :]
    dy = x_i[:, 1:2] - x_t[1:2, :]
    dz = x_i[:, 2:3] - x_t[2:3, :]
    nsq = dx * dx + dy * dy + dz * dz + EPSILON          # (TI, N)
    nrm = jnp.sqrt(nsq)
    inv = 1.0 / nsq                                      # dir = diff / ||diff||^2
    vs = (dx * inv, dy * inv, dz * inv)

    e = jnp.exp(alpha * (CUTOFF_LOWER - nrm))            # (TI, N), lane-dense exp
    e_t = jnp.concatenate([e] * R, axis=1)               # (TI, R*N), col r*N+j -> e[i,j]
    sm = jnp.exp(-betas_ref[...] * (e_t - means_ref[...]) ** 2)   # (TI, R*N)

    rhs = rhs_ref[...]                   # (R*N, PAD): cols [K | Q | per-r indicator | 0]
    kq_i = kq_i_ref[...]                 # (TI, R*2H): cols r*2H + c -> (kp|qp)[i, r, c]

    att = jnp.zeros((TI, H), jnp.float32)
    for v in vs:                                         # static unroll over x,y,z
        lhs = sm * jnp.concatenate([v] * R, axis=1)      # (TI, R*N)
        res = jnp.dot(lhs, rhs, preferred_element_type=jnp.float32)
        acc = res[:, :H2]                                # "j" half of the pair tensor
        for r in range(R):                               # "i" half: s1_r * (kp|qp)[i,r,:]
            acc = acc + res[:, H2 + r:H2 + r + 1] * kq_i[:, r * H2:(r + 1) * H2]
        att = att + acc[:, :H] * acc[:, H:]              # sum_b A_k * A_q

    # fc_summary: SiLU -> Linear(H,H) -> SiLU -> Linear(H, 2*OF*R)
    a1 = att * jax.nn.sigmoid(att)
    z1 = jnp.dot(a1, w1_ref[...], preferred_element_type=jnp.float32) + b1_ref[...]
    a2 = z1 * jax.nn.sigmoid(z1)
    out_ref[...] = jnp.dot(a2, w2_ref[...],
                           preferred_element_type=jnp.float32) + b2_ref[...]


# ----------------------------------------------------------------------------
# Kernel 2: pair-sum broadcast of the per-particle summary, lane-dense output.
# out[i, j, :] = y[i, :] + y[j, :]        (OUT = 2*OF*R, lane-dense)
# ----------------------------------------------------------------------------
def _pair_sum_kernel(y_i_ref, y_all_ref, out_ref):
    out_ref[...] = y_i_ref[...][:, None, :] + y_all_ref[...][None, :, :]


# ----------------------------------------------------------------------------
# Wrapper
# ----------------------------------------------------------------------------
def transductive_parameter(x, h, params, *, hidden_features, num_rbf, out_features,
                           tile_i=32, tile_pair=16):
    N = x.shape[0]
    R, H, OF = num_rbf, hidden_features, out_features
    OUT = 2 * OF * R
    H2 = 2 * H
    alpha = 5.0 / (CUTOFF_UPPER - CUTOFF_LOWER)
    assert N % tile_i == 0 and N % tile_pair == 0

    # ---- hoisted grid-invariant projection fc(h) and precomputed MXU operands ----
    hp = h @ params["w_fc"]                               # (N, 2*R*H)
    kp = hp[:, :R * H].reshape(N, R, H)                   # kp[j, r, c]
    qp = hp[:, R * H:].reshape(N, R, H)
    kq_rows = jnp.concatenate([kp, qp], axis=-1)          # (N, R, 2H)
    kq_stack = kq_rows.transpose(1, 0, 2).reshape(R * N, H2)   # row r*N+j -> (kp|qp)[j,r,:]
    ones_blk = jnp.repeat(jnp.eye(R, dtype=jnp.float32), N, axis=0)   # row r*N+j -> e_r
    rhs = jnp.concatenate([kq_stack, ones_blk], axis=1)   # (R*N, 2H+R)
    rhs_cols = _round_up(H2 + R, 128)                     # lane-dense matmul result
    rhs = jnp.pad(rhs, ((0, 0), (0, rhs_cols - (H2 + R))))
    kq_i = kq_rows.reshape(N, R * H2)                     # per-row projections, lane-flat
    means_rep = jnp.repeat(params["means"], N, axis=1)    # (1, R*N)
    betas_rep = jnp.repeat(params["betas"], N, axis=1)    # (1, R*N)
    x_t = jnp.transpose(x)                                # (3, N)

    vmem_limit = 48 * 1024 * 1024   # explicit, safe on v5e/v6e/v7x

    cost1 = pl.CostEstimate(
        flops=int(6 * N * R * N * rhs_cols + 4 * N * H * (H + OUT) + 8 * N * N * R),
        transcendentals=int(N * N * (R + 2) + 2 * N * H),
        bytes_accessed=int(4 * (6 * N + R * N * rhs_cols + N * R * H2 + 2 * R * N
                                + H * H + H + H * OUT + OUT + N * OUT)))

    kernel1 = functools.partial(_summary_kernel, alpha=alpha, num_rbf=R)
    y = pl.pallas_call(
        kernel1,
        out_shape=jax.ShapeDtypeStruct((N, OUT), jnp.float32),
        grid_spec=pltpu.PrefetchScalarGridSpec(
            num_scalar_prefetch=0,
            grid=(N // tile_i,),
            in_specs=[
                pl.BlockSpec((tile_i, 3), lambda i: (i, 0)),          # x rows of tile
                pl.BlockSpec((3, N), lambda i: (0, 0)),               # x^T (all cols)
                pl.BlockSpec((R * N, rhs_cols), lambda i: (0, 0)),    # stacked K|Q|1 RHS
                pl.BlockSpec((tile_i, R * H2), lambda i: (i, 0)),     # (kp|qp) rows of tile
                pl.BlockSpec((1, R * N), lambda i: (0, 0)),           # smearing means (rep)
                pl.BlockSpec((1, R * N), lambda i: (0, 0)),           # smearing betas (rep)
                pl.BlockSpec((H, H), lambda i: (0, 0)),               # W_summary1
                pl.BlockSpec((1, H), lambda i: (0, 0)),               # b_summary1
                pl.BlockSpec((H, OUT), lambda i: (0, 0)),             # W_summary2
                pl.BlockSpec((1, OUT), lambda i: (0, 0)),             # b_summary2
            ],
            out_specs=pl.BlockSpec((tile_i, OUT), lambda i: (i, 0)),
        ),
        compiler_params=pltpu.CompilerParams(
            dimension_semantics=("parallel",),
            vmem_limit_bytes=vmem_limit),
        cost_estimate=cost1,
    )(x, x_t, rhs, kq_i, means_rep, betas_rep,
      params["w_s1"], params["b_s1"], params["w_s2"], params["b_s2"])

    cost2 = pl.CostEstimate(
        flops=int(N * N * OUT),
        transcendentals=0,
        bytes_accessed=int(4 * (N * N * OUT + 2 * N * OUT)))

    raw = pl.pallas_call(
        _pair_sum_kernel,
        out_shape=jax.ShapeDtypeStruct((N, N, OUT), jnp.float32),
        grid_spec=pltpu.PrefetchScalarGridSpec(
            num_scalar_prefetch=0,
            grid=(N // tile_pair,),
            in_specs=[
                pl.BlockSpec((tile_pair, OUT), lambda i: (i, 0)),     # y rows of tile
                pl.BlockSpec((N, OUT), lambda i: (0, 0)),             # y (all rows)
            ],
            out_specs=pl.BlockSpec((tile_pair, N, OUT), lambda i: (i, 0, 0)),
        ),
        compiler_params=pltpu.CompilerParams(
            dimension_semantics=("parallel",),
            vmem_limit_bytes=vmem_limit),
        cost_estimate=cost2,
    )(y, y)

    # metadata-only glue: reshape + chunk(2, -1)
    out = raw.reshape(N, N, R, 2 * OF)
    return out[..., :OF], out[..., OF:]


# ----------------------------------------------------------------------------
# Pure-JAX reference mirroring the PyTorch forward pass
# ----------------------------------------------------------------------------
def _reference(x, h, params, *, hidden_features, num_rbf, out_features):
    alpha = 5.0 / (CUTOFF_UPPER - CUTOFF_LOWER)
    N = x.shape[0]
    R, H, OF = num_rbf, hidden_features, out_features

    hp = h @ params["w_fc"]                              # fc(h), (N, 2*R*H)
    pair = hp[:, None, :] + hp[None, :, :]               # (N, N, 2*R*H)
    Kp = pair[..., :R * H].reshape(N, N, R, H)
    Qp = pair[..., R * H:].reshape(N, N, R, H)

    diff = x[:, None, :] - x[None, :, :]                 # (N, N, 3)
    nsq = (diff ** 2).sum(-1, keepdims=True) + EPSILON
    nrm = jnp.sqrt(nsq)
    dirv = diff / nsq
    sm = jnp.exp(-params["betas"][0] *
                 (jnp.exp(alpha * (CUTOFF_LOWER - nrm)) - params["means"][0]) ** 2)
    basis = sm[..., :, None] * dirv[..., None, :]        # (N, N, R, 3)

    bk = jnp.einsum('ijrb,ijrc->icb', basis, Kp)
    bq = jnp.einsum('ijrb,ijrc->icb', basis, Qp)
    att = jnp.einsum('icb,icb->ic', bk, bq)              # (N, H)

    a1 = att * jax.nn.sigmoid(att)
    z1 = a1 @ params["w_s1"] + params["b_s1"][0]
    a2 = z1 * jax.nn.sigmoid(z1)
    y = a2 @ params["w_s2"] + params["b_s2"][0]          # (N, 2*OF*R)

    y2 = y.reshape(N, R, 2 * OF)
    out = y2[:, None, :, :] + y2[None, :, :, :]          # (N, N, R, 2*OF)
    return out[..., :OF], out[..., OF:]


def _init_params(key, in_features, hidden_features, num_rbf, out_features):
    R, H, F = num_rbf, hidden_features, in_features
    OUT = 2 * out_features * R
    ks = jax.random.split(key, 3)

    def lin(k, fan_in, shape):
        return jax.random.normal(k, shape, jnp.float32) / math.sqrt(fan_in)

    params = {
        # all weights stored transposed (in, out) so kernels do x @ W
        "w_fc": lin(ks[0], F, (F, 2 * R * H)),            # Linear(F, 2*R*H), no bias
        "w_s1": lin(ks[1], H, (H, H)),                    # fc_summary Linear(H, H)
        "b_s1": jnp.full((1, H), 0.01, jnp.float32),
        "w_s2": lin(ks[2], H, (H, OUT)),                  # fc_summary Linear(H, OUT)
        "b_s2": jnp.full((1, OUT), -0.02, jnp.float32),
    }
    # ExpNormalSmearing initial params (cutoff 0..5)
    start = math.exp(-CUTOFF_UPPER + CUTOFF_LOWER)
    params["means"] = jnp.linspace(start, 1.0, R, dtype=jnp.float32).reshape(1, R)
    beta_val = (2.0 / R * (1.0 - start)) ** -2
    params["betas"] = jnp.full((1, R), beta_val, jnp.float32)
    return params


if __name__ == "__main__":
    N = 64                 # particles
    in_features = 16
    hidden_features = 32
    num_rbf = 8
    out_features = 8       # => OUT = 2*OF*R = 128 (lane-dense output)

    key = jax.random.PRNGKey(0)
    kx, kh, kparam = jax.random.split(key, 3)
    x = jax.random.normal(kx, (N, 3), jnp.float32) * 2.0
    h = jax.random.normal(kh, (N, in_features), jnp.float32)
    params = _init_params(kparam, in_features, hidden_features, num_rbf, out_features)

    K, Q = transductive_parameter(
        x, h, params, hidden_features=hidden_features, num_rbf=num_rbf,
        out_features=out_features, tile_i=32, tile_pair=16)
    jax.block_until_ready((K, Q))

    K_ref, Q_ref = _reference(x, h, params, hidden_features=hidden_features,
                              num_rbf=num_rbf, out_features=out_features)
    assert K.shape == (N, N, num_rbf, out_features)
    assert Q.shape == (N, N, num_rbf, out_features)
    assert jnp.allclose(K, K_ref, atol=1e-3, rtol=1e-3), \
        float(jnp.max(jnp.abs(K - K_ref)))
    assert jnp.allclose(Q, Q_ref, atol=1e-3, rtol=1e-3), \
        float(jnp.max(jnp.abs(Q - Q_ref)))
    print("KERNEL_OK")
</pallas_src>

<mosaic_0001>
module attributes {stable_mosaic.version = 11 : i64} {
  func.func @_summary_kernel(%arg0: i32, %arg1: memref<32x3xf32, #tpu.memory_space<vmem>>, %arg2: memref<3x64xf32, #tpu.memory_space<vmem>>, %arg3: memref<512x128xf32, #tpu.memory_space<vmem>>, %arg4: memref<32x512xf32, #tpu.memory_space<vmem>>, %arg5: memref<1x512xf32, #tpu.memory_space<vmem>>, %arg6: memref<1x512xf32, #tpu.memory_space<vmem>>, %arg7: memref<32x32xf32, #tpu.memory_space<vmem>>, %arg8: memref<1x32xf32, #tpu.memory_space<vmem>>, %arg9: memref<32x128xf32, #tpu.memory_space<vmem>>, %arg10: memref<1x128xf32, #tpu.memory_space<vmem>>, %arg11: memref<32x128xf32, #tpu.memory_space<vmem>>) attributes {dimension_semantics = [#tpu.dimension_semantics<parallel>], iteration_bounds = array<i64: 2>, scalar_prefetch = 0 : i64, scratch_operands = 0 : i64, tpu.core_type = #tpu.core_type<tc>, window_params = [{transform_indices = @transform_0, window_bounds = array<i64: 32, 3>}, {pipeline_mode = #tpu.pipeline_mode<synchronous>, transform_indices = @transform_1, window_bounds = array<i64: 3, 64>}, {pipeline_mode = #tpu.pipeline_mode<synchronous>, transform_indices = @transform_2, window_bounds = array<i64: 512, 128>}, {transform_indices = @transform_3, window_bounds = array<i64: 32, 512>}, {pipeline_mode = #tpu.pipeline_mode<synchronous>, transform_indices = @transform_4, window_bounds = array<i64: 1, 512>}, {pipeline_mode = #tpu.pipeline_mode<synchronous>, transform_indices = @transform_5, window_bounds = array<i64: 1, 512>}, {pipeline_mode = #tpu.pipeline_mode<synchronous>, transform_indices = @transform_6, window_bounds = array<i64: 32, 32>}, {pipeline_mode = #tpu.pipeline_mode<synchronous>, transform_indices = @transform_7, window_bounds = array<i64: 1, 32>}, {pipeline_mode = #tpu.pipeline_mode<synchronous>, transform_indices = @transform_8, window_bounds = array<i64: 32, 128>}, {pipeline_mode = #tpu.pipeline_mode<synchronous>, transform_indices = @transform_9, window_bounds = array<i64: 1, 128>}, {transform_indices = @transform_10, window_bounds = array<i64: 32, 128>}]} {
    %c0 = arith.constant 0 : index
    %c0_0 = arith.constant 0 : index
    %0 = vector.load %arg1[%c0, %c0_0] : memref<32x3xf32, #tpu.memory_space<vmem>>, vector<32x3xf32>
    %c0_1 = arith.constant 0 : index
    %c0_2 = arith.constant 0 : index
    %1 = vector.load %arg2[%c0_1, %c0_2] : memref<3x64xf32, #tpu.memory_space<vmem>>, vector<3x64xf32>
    %2 = vector.extract_strided_slice %0 {offsets = [0, 0], sizes = [32, 1], strides = [1, 1]} : vector<32x3xf32> to vector<32x1xf32>
    %3 = vector.extract_strided_slice %1 {offsets = [0, 0], sizes = [1, 64], strides = [1, 1]} : vector<3x64xf32> to vector<1x64xf32>
    %4 = vector.broadcast %2 : vector<32x1xf32> to vector<32x64xf32>
    %5 = vector.broadcast %3 : vector<1x64xf32> to vector<32x64xf32>
    %6 = arith.subf %4, %5 : vector<32x64xf32>
    %7 = vector.extract_strided_slice %0 {offsets = [0, 1], sizes = [32, 1], strides = [1, 1]} : vector<32x3xf32> to vector<32x1xf32>
    %8 = vector.extract_strided_slice %1 {offsets = [1, 0], sizes = [1, 64], strides = [1, 1]} : vector<3x64xf32> to vector<1x64xf32>
    %9 = vector.broadcast %7 : vector<32x1xf32> to vector<32x64xf32>
    %10 = vector.broadcast %8 : vector<1x64xf32> to vector<32x64xf32>
    %11 = arith.subf %9, %10 : vector<32x64xf32>
    %12 = vector.extract_strided_slice %0 {offsets = [0, 2], sizes = [32, 1], strides = [1, 1]} : vector<32x3xf32> to vector<32x1xf32>
    %13 = vector.extract_strided_slice %1 {offsets = [2, 0], sizes = [1, 64], strides = [1, 1]} : vector<3x64xf32> to vector<1x64xf32>
    %14 = vector.broadcast %12 : vector<32x1xf32> to vector<32x64xf32>
    %15 = vector.broadcast %13 : vector<1x64xf32> to vector<32x64xf32>
    %16 = arith.subf %14, %15 : vector<32x64xf32>
    %17 = arith.mulf %6, %6 : vector<32x64xf32>
    %18 = arith.mulf %11, %11 : vector<32x64xf32>
    %19 = arith.addf %17, %18 : vector<32x64xf32>
    %20 = arith.mulf %16, %16 : vector<32x64xf32>
    %21 = arith.addf %19, %20 : vector<32x64xf32>
    %cst = arith.constant 9.99999974E-6 : f32
    %22 = vector.broadcast %cst : f32 to vector<32x64xf32>
    %23 = arith.addf %21, %22 : vector<32x64xf32>
    %24 = math.sqrt %23 : vector<32x64xf32>
    %cst_3 = arith.constant 1.000000e+00 : f32
    %25 = vector.broadcast %cst_3 : f32 to vector<32x64xf32>
    %26 = arith.divf %25, %23 : vector<32x64xf32>
    %27 = arith.mulf %6, %26 : vector<32x64xf32>
    %28 = arith.mulf %11, %26 : vector<32x64xf32>
    %29 = arith.mulf %16, %26 : vector<32x64xf32>
    %cst_4 = arith.constant 0.000000e+00 : f32
    %30 = vector.broadcast %cst_4 : f32 to vector<32x64xf32>
    %31 = arith.subf %30, %24 : vector<32x64xf32>
    %cst_5 = arith.constant 1.000000e+00 : f32
    %32 = vector.broadcast %cst_5 : f32 to vector<32x64xf32>
    %33 = arith.mulf %32, %31 : vector<32x64xf32>
    %34 = math.exp %33 : vector<32x64xf32>
    %35 = tpu.concatenate %34, %34, %34, %34, %34, %34, %34, %34 in 1 : vector<32x64xf32>, vector<32x64xf32>, vector<32x64xf32>, vector<32x64xf32>, vector<32x64xf32>, vector<32x64xf32>, vector<32x64xf32>, vector<32x64xf32> -> vector<32x512xf32>
    %c0_6 = arith.constant 0 : index
    %c0_7 = arith.constant 0 : index
    %36 = vector.load %arg6[%c0_6, %c0_7] : memref<1x512xf32, #tpu.memory_space<vmem>>, vector<1x512xf32>
    %cst_8 = arith.constant 0.000000e+00 : f32
    %37 = vector.broadcast %cst_8 : f32 to vector<1x512xf32>
    %38 = arith.subf %37, %36 : vector<1x512xf32>
    %c0_9 = arith.constant 0 : index
    %c0_10 = arith.constant 0 : index
    %39 = vector.load %arg5[%c0_9, %c0_10] : memref<1x512xf32, #tpu.memory_space<vmem>>, vector<1x512xf32>
    %40 = vector.broadcast %39 : vector<1x512xf32> to vector<32x512xf32>
    %41 = arith.subf %35, %40 : vector<32x512xf32>
    %42 = arith.mulf %41, %41 : vector<32x512xf32>
    %43 = vector.broadcast %38 : vector<1x512xf32> to vector<32x512xf32>
    %44 = arith.mulf %43, %42 : vector<32x512xf32>
    %45 = math.exp %44 : vector<32x512xf32>
    %c0_11 = arith.constant 0 : index
    %c0_12 = arith.constant 0 : index
    %46 = vector.load %arg3[%c0_11, %c0_12] : memref<512x128xf32, #tpu.memory_space<vmem>>, vector<512x128xf32>
    %c0_13 = arith.constant 0 : index
    %c0_14 = arith.constant 0 : index
    %47 = vector.load %arg4[%c0_13, %c0_14] : memref<32x512xf32, #tpu.memory_space<vmem>>, vector<32x512xf32>
    %cst_15 = arith.constant 0.000000e+00 : f32
    %48 = vector.broadcast %cst_15 : f32 to vector<32x32xf32>
    %49 = tpu.concatenate %27, %27, %27, %27, %27, %27, %27, %27 in 1 : vector<32x64xf32>, vector<32x64xf32>, vector<32x64xf32>, vector<32x64xf32>, vector<32x64xf32>, vector<32x64xf32>, vector<32x64xf32>, vector<32x64xf32> -> vector<32x512xf32>
    %50 = arith.mulf %45, %49 : vector<32x512xf32>
    %cst_16 = arith.constant dense<0.000000e+00> : vector<32x128xf32>
    %51 = tpu.matmul %50, %46, %cst_16 {dimension_numbers = #tpu.dot_dimension_numbers<[1], [0], [0], [1], [0, 0, 1, 1], [], []>} : vector<32x512xf32>, vector<512x128xf32>, vector<32x128xf32> -> vector<32x128xf32>
    %52 = vector.extract_strided_slice %51 {offsets = [0, 0], sizes = [32, 64], strides = [1, 1]} : vector<32x128xf32> to vector<32x64xf32>
    %53 = vector.extract_strided_slice %51 {offsets = [0, 64], sizes = [32, 1], strides = [1, 1]} : vector<32x128xf32> to vector<32x1xf32>
    %54 = vector.extract_strided_slice %47 {offsets = [0, 0], sizes = [32, 64], strides = [1, 1]} : vector<32x512xf32> to vector<32x64xf32>
    %55 = vector.broadcast %53 : vector<32x1xf32> to vector<32x64xf32>
    %56 = arith.mulf %55, %54 : vector<32x64xf32>
    %57 = arith.addf %52, %56 : vector<32x64xf32>
    %58 = vector.extract_strided_slice %51 {offsets = [0, 65], sizes = [32, 1], strides = [1, 1]} : vector<32x128xf32> to vector<32x1xf32>
    %59 = vector.extract_strided_slice %47 {offsets = [0, 64], sizes = [32, 64], strides = [1, 1]} : vector<32x512xf32> to vector<32x64xf32>
    %60 = vector.broadcast %58 : vector<32x1xf32> to vector<32x64xf32>
    %61 = arith.mulf %60, %59 : vector<32x64xf32>
    %62 = arith.addf %57, %61 : vector<32x64xf32>
    %63 = vector.extract_strided_slice %51 {offsets = [0, 66], sizes = [32, 1], strides = [1, 1]} : vector<32x128xf32> to vector<32x1xf32>
    %64 = vector.extract_strided_slice %47 {offsets = [0, 128], sizes = [32, 64], strides = [1, 1]} : vector<32x512xf32> to vector<32x64xf32>
    %65 = vector.broadcast %63 : vector<32x1xf32> to vector<32x64xf32>
    %66 = arith.mulf %65, %64 : vector<32x64xf32>
    %67 = arith.addf %62, %66 : vector<32x64xf32>
    %68 = vector.extract_strided_slice %51 {offsets = [0, 67], sizes = [32, 1], strides = [1, 1]} : vector<32x128xf32> to vector<32x1xf32>
    %69 = vector.extract_strided_slice %47 {offsets = [0, 192], sizes = [32, 64], strides = [1, 1]} : vector<32x512xf32> to vector<32x64xf32>
    %70 = vector.broadcast %68 : vector<32x1xf32> to vector<32x64xf32>
    %71 = arith.mulf %70, %69 : vector<32x64xf32>
    %72 = arith.addf %67, %71 : vector<32x64xf32>
    %73 = vector.extract_strided_slice %51 {offsets = [0, 68], sizes = [32, 1], strides = [1, 1]} : vector<32x128xf32> to vector<32x1xf32>
    %74 = vector.extract_strided_slice %47 {offsets = [0, 256], sizes = [32, 64], strides = [1, 1]} : vector<32x512xf32> to vector<32x64xf32>
    %75 = vector.broadcast %73 : vector<32x1xf32> to vector<32x64xf32>
    %76 = arith.mulf %75, %74 : vector<32x64xf32>
    %77 = arith.addf %72, %76 : vector<32x64xf32>
    %78 = vector.extract_strided_slice %51 {offsets = [0, 69], sizes = [32, 1], strides = [1, 1]} : vector<32x128xf32> to vector<32x1xf32>
    %79 = vector.extract_strided_slice %47 {offsets = [0, 320], sizes = [32, 64], strides = [1, 1]} : vector<32x512xf32> to vector<32x64xf32>
    %80 = vector.broadcast %78 : vector<32x1xf32> to vector<32x64xf32>
    %81 = arith.mulf %80, %79 : vector<32x64xf32>
    %82 = arith.addf %77, %81 : vector<32x64xf32>
    %83 = vector.extract_strided_slice %51 {offsets = [0, 70], sizes = [32, 1], strides = [1, 1]} : vector<32x128xf32> to vector<32x1xf32>
    %84 = vector.extract_strided_slice %47 {offsets = [0, 384], sizes = [32, 64], strides = [1, 1]} : vector<32x512xf32> to vector<32x64xf32>
    %85 = vector.broadcast %83 : vector<32x1xf32> to vector<32x64xf32>
    %86 = arith.mulf %85, %84 : vector<32x64xf32>
    %87 = arith.addf %82, %86 : vector<32x64xf32>
    %88 = vector.extract_strided_slice %51 {offsets = [0, 71], sizes = [32, 1], strides = [1, 1]} : vector<32x128xf32> to vector<32x1xf32>
    %89 = vector.extract_strided_slice %47 {offsets = [0, 448], sizes = [32, 64], strides = [1, 1]} : vector<32x512xf32> to vector<32x64xf32>
    %90 = vector.broadcast %88 : vector<32x1xf32> to vector<32x64xf32>
    %91 = arith.mulf %90, %89 : vector<32x64xf32>
    %92 = arith.addf %87, %91 : vector<32x64xf32>
    %93 = vector.extract_strided_slice %92 {offsets = [0, 0], sizes = [32, 32], strides = [1, 1]} : vector<32x64xf32> to vector<32x32xf32>
    %94 = vector.extract_strided_slice %92 {offsets = [0, 32], sizes = [32, 32], strides = [1, 1]} : vector<32x64xf32> to vector<32x32xf32>
    %95 = arith.mulf %93, %94 : vector<32x32xf32>
    %96 = arith.addf %48, %95 : vector<32x32xf32>
    %97 = tpu.concatenate %28, %28, %28, %28, %28, %28, %28, %28 in 1 : vector<32x64xf32>, vector<32x64xf32>, vector<32x64xf32>, vector<32x64xf32>, vector<32x64xf32>, vector<32x64xf32>, vector<32x64xf32>, vector<32x64xf32> -> vector<32x512xf32>
    %98 = arith.mulf %45, %97 : vector<32x512xf32>
    %cst_17 = arith.constant dense<0.000000e+00> : vector<32x128xf32>
    %99 = tpu.matmul %98, %46, %cst_17 {dimension_numbers = #tpu.dot_dimension_numbers<[1], [0], [0], [1], [0, 0, 1, 1], [], []>} : vector<32x512xf32>, vector<512x128xf32>, vector<32x128xf32> -> vector<32x128xf32>
    %100 = vector.extract_strided_slice %99 {offsets = [0, 0], sizes = [32, 64], strides = [1, 1]} : vector<32x128xf32> to vector<32x64xf32>
    %101 = vector.extract_strided_slice %99 {offsets = [0, 64], sizes = [32, 1], strides = [1, 1]} : vector<32x128xf32> to vector<32x1xf32>
    %102 = vector.extract_strided_slice %47 {offsets = [0, 0], sizes = [32, 64], strides = [1, 1]} : vector<32x512xf32> to vector<32x64xf32>
    %103 = vector.broadcast %101 : vector<32x1xf32> to vector<32x64xf32>
    %104 = arith.mulf %103, %102 : vector<32x64xf32>
    %105 = arith.addf %100, %104 : vector<32x64xf32>
    %106 = vector.extract_strided_slice %99 {offsets = [0, 65], sizes = [32, 1], strides = [1, 1]} : vector<32x128xf32> to vector<32x1xf32>
    %107 = vector.extract_strided_slice %47 {offsets = [0, 64], sizes = [32, 64], strides = [1, 1]} : vector<32x512xf32> to vector<32x64xf32>
    %108 = vector.broadcast %106 : vector<32x1xf32> to vector<32x64xf32>
    %109 = arith.mulf %108, %107 : vector<32x64xf32>
    %110 = arith.addf %105, %109 : vector<32x64xf32>
    %111 = vector.extract_strided_slice %99 {offsets = [0, 66], sizes = [32, 1], strides = [1, 1]} : vector<32x128xf32> to vector<32x1xf32>
    %112 = vector.extract_strided_slice %47 {offsets = [0, 128], sizes = [32, 64], strides = [1, 1]} : vector<32x512xf32> to vector<32x64xf32>
    %113 = vector.broadcast %111 : vector<32x1xf32> to vector<32x64xf32>
    %114 = arith.mulf %113, %112 : vector<32x64xf32>
    %115 = arith.addf %110, %114 : vector<32x64xf32>
    %116 = vector.extract_strided_slice %99 {offsets = [0, 67], sizes = [32, 1], strides = [1, 1]} : vector<32x128xf32> to vector<32x1xf32>
    %117 = vector.extract_strided_slice %47 {offsets = [0, 192], sizes = [32, 64], strides = [1, 1]} : vector<32x512xf32> to vector<32x64xf32>
    %118 = vector.broadcast %116 : vector<32x1xf32> to vector<32x64xf32>
    %119 = arith.mulf %118, %117 : vector<32x64xf32>
    %120 = arith.addf %115, %119 : vector<32x64xf32>
    %121 = vector.extract_strided_slice %99 {offsets = [0, 68], sizes = [32, 1], strides = [1, 1]} : vector<32x128xf32> to vector<32x1xf32>
    %122 = vector.extract_strided_slice %47 {offsets = [0, 256], sizes = [32, 64], strides = [1, 1]} : vector<32x512xf32> to vector<32x64xf32>
    %123 = vector.broadcast %121 : vector<32x1xf32> to vector<32x64xf32>
    %124 = arith.mulf %123, %122 : vector<32x64xf32>
    %125 = arith.addf %120, %124 : vector<32x64xf32>
    %126 = vector.extract_strided_slice %99 {offsets = [0, 69], sizes = [32, 1], strides = [1, 1]} : vector<32x128xf32> to vector<32x1xf32>
    %127 = vector.extract_strided_slice %47 {offsets = [0, 320], sizes = [32, 64], strides = [1, 1]} : vector<32x512xf32> to vector<32x64xf32>
    %128 = vector.broadcast %126 : vector<32x1xf32> to vector<32x64xf32>
    %129 = arith.mulf %128, %127 : vector<32x64xf32>
    %130 = arith.addf %125, %129 : vector<32x64xf32>
    %131 = vector.extract_strided_slice %99 {offsets = [0, 70], sizes = [32, 1], strides = [1, 1]} : vector<32x128xf32> to vector<32x1xf32>
    %132 = vector.extract_strided_slice %47 {offsets = [0, 384], sizes = [32, 64], strides = [1, 1]} : vector<32x512xf32> to vector<32x64xf32>
    %133 = vector.broadcast %131 : vector<32x1xf32> to vector<32x64xf32>
    %134 = arith.mulf %133, %132 : vector<32x64xf32>
    %135 = arith.addf %130, %134 : vector<32x64xf32>
    %136 = vector.extract_strided_slice %99 {offsets = [0, 71], sizes = [32, 1], strides = [1, 1]} : vector<32x128xf32> to vector<32x1xf32>
    %137 = vector.extract_strided_slice %47 {offsets = [0, 448], sizes = [32, 64], strides = [1, 1]} : vector<32x512xf32> to vector<32x64xf32>
    %138 = vector.broadcast %136 : vector<32x1xf32> to vector<32x64xf32>
    %139 = arith.mulf %138, %137 : vector<32x64xf32>
    %140 = arith.addf %135, %139 : vector<32x64xf32>
    %141 = vector.extract_strided_slice %140 {offsets = [0, 0], sizes = [32, 32], strides = [1, 1]} : vector<32x64xf32> to vector<32x32xf32>
    %142 = vector.extract_strided_slice %140 {offsets = [0, 32], sizes = [32, 32], strides = [1, 1]} : vector<32x64xf32> to vector<32x32xf32>
    %143 = arith.mulf %141, %142 : vector<32x32xf32>
    %144 = arith.addf %96, %143 : vector<32x32xf32>
    %145 = tpu.concatenate %29, %29, %29, %29, %29, %29, %29, %29 in 1 : vector<32x64xf32>, vector<32x64xf32>, vector<32x64xf32>, vector<32x64xf32>, vector<32x64xf32>, vector<32x64xf32>, vector<32x64xf32>, vector<32x64xf32> -> vector<32x512xf32>
    %146 = arith.mulf %45, %145 : vector<32x512xf32>
    %cst_18 = arith.constant dense<0.000000e+00> : vector<32x128xf32>
    %147 = tpu.matmul %146, %46, %cst_18 {dimension_numbers = #tpu.dot_dimension_numbers<[1], [0], [0], [1], [0, 0, 1, 1], [], []>} : vector<32x512xf32>, vector<512x128xf32>, vector<32x128xf32> -> vector<32x128xf32>
    %148 = vector.extract_strided_slice %147 {offsets = [0, 0], sizes = [32, 64], strides = [1, 1]} : vector<32x128xf32> to vector<32x64xf32>
    %149 = vector.extract_strided_slice %147 {offsets = [0, 64], sizes = [32, 1], strides = [1, 1]} : vector<32x128xf32> to vector<32x1xf32>
    %150 = vector.extract_strided_slice %47 {offsets = [0, 0], sizes = [32, 64], strides = [1, 1]} : vector<32x512xf32> to vector<32x64xf32>
    %151 = vector.broadcast %149 : vector<32x1xf32> to vector<32x64xf32>
    %152 = arith.mulf %151, %150 : vector<32x64xf32>
    %153 = arith.addf %148, %152 : vector<32x64xf32>
    %154 = vector.extract_strided_slice %147 {offsets = [0, 65], sizes = [32, 1], strides = [1, 1]} : vector<32x128xf32> to vector<32x1xf32>
    %155 = vector.extract_strided_slice %47 {offsets = [0, 64], sizes = [32, 64], strides = [1, 1]} : vector<32x512xf32> to vector<32x64xf32>
    %156 = vector.broadcast %154 : vector<32x1xf32> to vector<32x64xf32>
    %157 = arith.mulf %156, %155 : vector<32x64xf32>
    %158 = arith.addf %153, %157 : vector<32x64xf32>
    %159 = vector.extract_strided_slice %147 {offsets = [0, 66], sizes = [32, 1], strides = [1, 1]} : vector<32x128xf32> to vector<32x1xf32>
    %160 = vector.extract_strided_slice %47 {offsets = [0, 128], sizes = [32, 64], strides = [1, 1]} : vector<32x512xf32> to vector<32x64xf32>
    %161 = vector.broadcast %159 : vector<32x1xf32> to vector<32x64xf32>
    %162 = arith.mulf %161, %160 : vector<32x64xf32>
    %163 = arith.addf %158, %162 : vector<32x64xf32>
    %164 = vector.extract_strided_slice %147 {offsets = [0, 67], sizes = [32, 1], strides = [1, 1]} : vector<32x128xf32> to vector<32x1xf32>
    %165 = vector.extract_strided_slice %47 {offsets = [0, 192], sizes = [32, 64], strides = [1, 1]} : vector<32x512xf32> to vector<32x64xf32>
    %166 = vector.broadcast %164 : vector<32x1xf32> to vector<32x64xf32>
    %167 = arith.mulf %166, %165 : vector<32x64xf32>
    %168 = arith.addf %163, %167 : vector<32x64xf32>
    %169 = vector.extract_strided_slice %147 {offsets = [0, 68], sizes = [32, 1], strides = [1, 1]} : vector<32x128xf32> to vector<32x1xf32>
    %170 = vector.extract_strided_slice %47 {offsets = [0, 256], sizes = [32, 64], strides = [1, 1]} : vector<32x512xf32> to vector<32x64xf32>
    %171 = vector.broadcast %169 : vector<32x1xf32> to vector<32x64xf32>
    %172 = arith.mulf %171, %170 : vector<32x64xf32>
    %173 = arith.addf %168, %172 : vector<32x64xf32>
    %174 = vector.extract_strided_slice %147 {offsets = [0, 69], sizes = [32, 1], strides = [1, 1]} : vector<32x128xf32> to vector<32x1xf32>
    %175 = vector.extract_strided_slice %47 {offsets = [0, 320], sizes = [32, 64], strides = [1, 1]} : vector<32x512xf32> to vector<32x64xf32>
    %176 = vector.broadcast %174 : vector<32x1xf32> to vector<32x64xf32>
    %177 = arith.mulf %176, %175 : vector<32x64xf32>
    %178 = arith.addf %173, %177 : vector<32x64xf32>
    %179 = vector.extract_strided_slice %147 {offsets = [0, 70], sizes = [32, 1], strides = [1, 1]} : vector<32x128xf32> to vector<32x1xf32>
    %180 = vector.extract_strided_slice %47 {offsets = [0, 384], sizes = [32, 64], strides = [1, 1]} : vector<32x512xf32> to vector<32x64xf32>
    %181 = vector.broadcast %179 : vector<32x1xf32> to vector<32x64xf32>
    %182 = arith.mulf %181, %180 : vector<32x64xf32>
    %183 = arith.addf %178, %182 : vector<32x64xf32>
    %184 = vector.extract_strided_slice %147 {offsets = [0, 71], sizes = [32, 1], strides = [1, 1]} : vector<32x128xf32> to vector<32x1xf32>
    %185 = vector.extract_strided_slice %47 {offsets = [0, 448], sizes = [32, 64], strides = [1, 1]} : vector<32x512xf32> to vector<32x64xf32>
    %186 = vector.broadcast %184 : vector<32x1xf32> to vector<32x64xf32>
    %187 = arith.mulf %186, %185 : vector<32x64xf32>
    %188 = arith.addf %183, %187 : vector<32x64xf32>
    %189 = vector.extract_strided_slice %188 {offsets = [0, 0], sizes = [32, 32], strides = [1, 1]} : vector<32x64xf32> to vector<32x32xf32>
    %190 = vector.extract_strided_slice %188 {offsets = [0, 32], sizes = [32, 32], strides = [1, 1]} : vector<32x64xf32> to vector<32x32xf32>
    %191 = arith.mulf %189, %190 : vector<32x32xf32>
    %192 = arith.addf %144, %191 : vector<32x32xf32>
    %193 = arith.negf %192 : vector<32x32xf32>
    %194 = math.exp %193 : vector<32x32xf32>
    %cst_19 = arith.constant 1.000000e+00 : f32
    %195 = vector.broadcast %cst_19 : f32 to vector<32x32xf32>
    %196 = arith.addf %195, %194 : vector<32x32xf32>
    %197 = arith.divf %195, %196 : vector<32x32xf32>
    %198 = arith.mulf %192, %197 : vector<32x32xf32>
    %c0_20 = arith.constant 0 : index
    %c0_21 = arith.constant 0 : index
    %199 = vector.load %arg7[%c0_20, %c0_21] : memref<32x32xf32, #tpu.memory_space<vmem>>, vector<32x32xf32>
    %cst_22 = arith.constant dense<0.000000e+00> : vector<32x32xf32>
    %200 = tpu.matmul %198, %199, %cst_22 {dimension_numbers = #tpu.dot_dimension_numbers<[1], [0], [0], [1], [0, 0, 1, 1], [], []>} : vector<32x32xf32>, vector<32x32xf32>, vector<32x32xf32> -> vector<32x32xf32>
    %c0_23 = arith.constant 0 : index
    %c0_24 = arith.constant 0 : index
    %201 = vector.load %arg8[%c0_23, %c0_24] : memref<1x32xf32, #tpu.memory_space<vmem>>, vector<1x32xf32>
    %202 = vector.broadcast %201 : vector<1x32xf32> to vector<32x32xf32>
    %203 = arith.addf %200, %202 : vector<32x32xf32>
    %204 = arith.negf %203 : vector<32x32xf32>
    %205 = math.exp %204 : vector<32x32xf32>
    %cst_25 = arith.constant 1.000000e+00 : f32
    %206 = vector.broadcast %cst_25 : f32 to vector<32x32xf32>
    %207 = arith.addf %206, %205 : vector<32x32xf32>
    %208 = arith.divf %206, %207 : vector<32x32xf32>
    %209 = arith.mulf %203, %208 : vector<32x32xf32>
    %c0_26 = arith.constant 0 : index
    %c0_27 = arith.constant 0 : index
    %210 = vector.load %arg9[%c0_26, %c0_27] : memref<32x128xf32, #tpu.memory_space<vmem>>, vector<32x128xf32>
    %cst_28 = arith.constant dense<0.000000e+00> : vector<32x128xf32>
    %211 = tpu.matmul %209, %210, %cst_28 {dimension_numbers = #tpu.dot_dimension_numbers<[1], [0], [0], [1], [0, 0, 1, 1], [], []>} : vector<32x32xf32>, vector<32x128xf32>, vector<32x128xf32> -> vector<32x128xf32>
    %c0_29 = arith.constant 0 : index
    %c0_30 = arith.constant 0 : index
    %212 = vector.load %arg10[%c0_29, %c0_30] : memref<1x128xf32, #tpu.memory_space<vmem>>, vector<1x128xf32>
    %213 = vector.broadcast %212 : vector<1x128xf32> to vector<32x128xf32>
    %214 = arith.addf %211, %213 : vector<32x128xf32>
    %c0_31 = arith.constant 0 : index
    %c0_32 = arith.constant 0 : index
    %215 = vector.load %arg11[%c0_31, %c0_32] : memref<32x128xf32, #tpu.memory_space<vmem>>, vector<32x128xf32>
    tpu.vector_store %arg11[%c0_31, %c0_32], %214 {strides = array<i32>} : memref<32x128xf32, #tpu.memory_space<vmem>>, vector<32x128xf32>,
    return
  }
  func.func @transform_0(%arg0: i32) -> (i32, i32) {
    %c0_i32 = arith.constant 0 : i32
    %c0_i32_0 = arith.constant 0 : i32
    return %arg0, %c0_i32 : i32, i32
  }
  func.func @transform_1(%arg0: i32) -> (i32, i32) {
    %c0_i32 = arith.constant 0 : i32
    %c0_i32_0 = arith.constant 0 : i32
    %c0_i32_1 = arith.constant 0 : i32
    return %c0_i32, %c0_i32_0 : i32, i32
  }
  func.func @transform_2(%arg0: i32) -> (i32, i32) {
    %c0_i32 = arith.constant 0 : i32
    %c0_i32_0 = arith.constant 0 : i32
    %c0_i32_1 = arith.constant 0 : i32
    return %c0_i32, %c0_i32_0 : i32, i32
  }
  func.func @transform_3(%arg0: i32) -> (i32, i32) {
    %c0_i32 = arith.constant 0 : i32
    %c0_i32_0 = arith.constant 0 : i32
    return %arg0, %c0_i32 : i32, i32
  }
  func.func @transform_4(%arg0: i32) -> (i32, i32) {
    %c0_i32 = arith.constant 0 : i32
    %c0_i32_0 = arith.constant 0 : i32
    %c0_i32_1 = arith.constant 0 : i32
    return %c0_i32, %c0_i32_0 : i32, i32
  }
  func.func @transform_5(%arg0: i32) -> (i32, i32) {
    %c0_i32 = arith.constant 0 : i32
    %c0_i32_0 = arith.constant 0 : i32
    %c0_i32_1 = arith.constant 0 : i32
    return %c0_i32, %c0_i32_0 : i32, i32
  }
  func.func @transform_6(%arg0: i32) -> (i32, i32) {
    %c0_i32 = arith.constant 0 : i32
    %c0_i32_0 = arith.constant 0 : i32
    %c0_i32_1 = arith.constant 0 : i32
    return %c0_i32, %c0_i32_0 : i32, i32
  }
  func.func @transform_7(%arg0: i32) -> (i32, i32) {
    %c0_i32 = arith.constant 0 : i32
    %c0_i32_0 = arith.constant 0 : i32
    %c0_i32_1 = arith.constant 0 : i32
    return %c0_i32, %c0_i32_0 : i32, i32
  }
  func.func @transform_8(%arg0: i32) -> (i32, i32) {
    %c0_i32 = arith.constant 0 : i32
    %c0_i32_0 = arith.constant 0 : i32
    %c0_i32_1 = arith.constant 0 : i32
    return %c0_i32, %c0_i32_0 : i32, i32
  }
  func.func @transform_9(%arg0: i32) -> (i32, i32) {
    %c0_i32 = arith.constant 0 : i32
    %c0_i32_0 = arith.constant 0 : i32
    %c0_i32_1 = arith.constant 0 : i32
    return %c0_i32, %c0_i32_0 : i32, i32
  }
  func.func @transform_10(%arg0: i32) -> (i32, i32) {
    %c0_i32 = arith.constant 0 : i32
    %c0_i32_0 = arith.constant 0 : i32
    return %arg0, %c0_i32 : i32, i32
  }
}

</mosaic_0001>

<bundles_post_ra>
// kernel: tpu_custom_call.1
= control target key start
LH: loop header
LB: loop body
LE: loop exit
PB: predicated region body
PF: predicated region fallthrough
CT: control target
= control target key end

     0   :  { %15 = vsyncpa [#allocation3], 0  ;;  %s5249_s0 = inlined_call_operand.vmem [shape: f32[64,3], index: 0, kind: input, shape index: {}]   ;;  %s5250_s1 = inlined_call_operand.vmem [shape: f32[3,64], index: 1, kind: input, shape index: {}]   ;;  %s5251_s2 = inlined_call_operand.hbm [shape: f32[512,128], index: 2, kind: input, shape index: {}]   ;;  %s5252_s3 = inlined_call_operand.hbm [shape: f32[64,512], index: 3, kind: input, shape index: {}]   ;;  %s5253_s4 = inlined_call_operand.vmem [shape: f32[1,512], index: 4, kind: input, shape index: {}]   ;;  %s5254_s5 = inlined_call_operand.vmem [shape: f32[1,512], index: 5, kind: input, shape index: {}]   ;;  %s5255_s6 = inlined_call_operand.vmem [shape: f32[32,32], index: 6, kind: input, shape index: {}]   ;;  %s5256_s7 = inlined_call_operand.vmem [shape: f32[1,32], index: 7, kind: input, shape index: {}]   ;;  %s5257_s8 = inlined_call_operand.vmem [shape: f32[32,128], index: 8, kind: input, shape index: {}]   ;;  %s5258_s9 = inlined_call_operand.vmem [shape: f32[1,128], index: 9, kind: input, shape index: {}]   ;;  %s5259_s10 = inlined_call_operand.hbm [shape: f32[64,128], index: 10, kind: output, shape index: {}]  }
   0x1   :  { %16 = vsyncpa [#allocation6], 0 }
   0x2   :  { %18 = vsyncpa [#allocation6 + $0x1], 0 }
   0x3   :  { %19 = vsyncpa [#allocation4], 0 }
   0x4   :  { %21 = vsyncpa [#allocation4 + $0x1], 0  ;;  %s3702_s13 = smov 0   ;;  %s3704_s14 = smov 0  }
   0x5   :  { %s3706_s15 = smov 0   ;;  %s3708_s16 = smov 0  }
   0x6 LB: > { %5291 = sst [smem:[#allocation11_spill]] %s3611_s13  ;;  %s3723_s17 = sadd.s32 4294967295, %s3623_s16   ;;  %s3623_s16 = sphi %s3708_s16, %s5407_s16   ;;  %s3619_s15 = sphi %s3706_s15, %s5410_s15   ;;  %s3615_s14 = sphi %s3704_s14, %s5409_s14   ;;  %s3611_s13 = sphi %s3702_s13, %s5408_s13  }
   0x7   : > { %s2667_s18 = sadd.s32 4294967294, %s3623_s16   ;;  %p115_p0 = scmp.ne.s32.totalorder %s3615_s14, %s3611_s13 }
   0x8   : > { %p5262_p1 = scmp.eq.s32.totalorder %s3723_s17, 0  ;;  %p271_p3 = scmp.eq.s32.totalorder %s2667_s18, 1 }
   0x9   : > { %p2668_p5 = scmp.ge.s32.totalorder %s3623_s16, 1  ;;  %p278_p7 = scmp.lt.s32.totalorder %s3623_s16, 3 }
   0xa   : > { %p3732_p4 = por %p5262_p1, %p115_p0  ;;  %p3737_p6 = por %p271_p3, %p115_p0 }
   0xb   : > { %p3742_p8 = pnand %p2668_p5, %p278_p7  ;;  %s3625_s22 = smov [#allocation2]  }
   0xc   : > { %s5292_s19 = scalar_select %p3732_p4, 1, 0 }
   0xd   : > { %s5293_s20 = scalar_select %p3737_p6, 1, 0 }
   0xe   : > { %s5295_s21 = scalar_select %p3742_p8, 1, 0 }
   0xf   : > { %5294 = sst [smem:[#allocation12_spill]] %s5293_s20  ;;  %s293_s23 = sshll.u32 %s3625_s22, 4  ;;  %s3746_s23 = int_to_ptr.vmem [resolvable:$true] %s293_s23 }
  0x10   : > { %p3231_p9 = pneg %p3742_p8  ;;  %s3758_s25 = sadd.s32 1, %s3623_s16  }
  0x11   : > { %5297 = sst [smem:[#allocation13_spill]] %s3758_s25  ;;  %s102_s26 = sadd.s32 1, %s3619_s15 }
  0x12   : > { %p3753_p11 = pnand %p3231_p9, %p5262_p1  ;;  %s99_s27 = ssub.s32 %s3623_s16, %s3758_s25 }
  0x13   : > { %s3495_s30 = scalar_lea.hbm %s5251_s2, 8192 }
  0x14   : > { %p3496_p12 = scmp.ne.s32.totalorder %s5251_s2, %s3495_s30  ;;  %p3497_p13 = pneg %p3753_p11 }
  0x15   : > { %p3502_p5 = scmp.lt.u32.totalorder %s3495_s30, %s5251_s2 }
  0x16   : > { %p3498_p0 = pnand %p3497_p13, %p3496_p12 }
  0x18   : > { %p3499_p3 = pneg %p3498_p0 }
  0x1a   : > { %p3504_p7 = pnand %p3502_p5, %p3499_p3 }
  0x1c   : > { %3507 = shalt.err (!%p3504_p7)
}
  0x1d   : > { %s3508_s25 = scalar_lea.vmem %s3746_s23, 8192  ;;  %p3516_p2 = scmp.lt.s32.totalorder %s3746_s23, %s3746_s23 }
  0x1e   : > { %p3509_p9 = scmp.ne.s32.totalorder %s3746_s23, %s3508_s25  ;;  %p3517_p6 = scmp.lt.s32.totalorder %s3508_s25, %s3508_s25 }
  0x20   : > { %p3511_p10 = pnand %p3509_p9, %p3497_p13  ;;  %p3518_p4 = por %p3517_p6, %p3516_p2 }
  0x22   : > { %p3512_p1 = pneg %p3511_p10 }
  0x24   : > { %p3519_p8 = pnand %p3518_p4, %p3512_p1 }
  0x26   : > { %3522 = shalt.err (!%p3519_p8)
}
  0x27   : > { %s3626_s28 = smov 128   ;;  %s3627_s29 = smov 8  }
  0x28   : > { %3234 = dma.hbm_to_vmem [thread:$0]  (!%p3753_p11), %s5251_s2, 8192, %s3746_s23, [#allocation3], %s3626_s28, %s3626_s28, %s3627_s29  }
  0x29   : > { %p100_p2 = scmp.eq.s32.totalorder %s99_s27, 0  ;;  %p109_p1 = scmp.ne.s32.totalorder %s3619_s15, %s3615_s14 }
  0x2a   : > { %p110_p4 = scmp.eq.s32.totalorder %s3623_s16, 0  ;;  %p3244_p6 = scmp.lt.s32.totalorder %s3623_s16, 2 }
  0x2b   : > { %s3789_s25 = scalar_select %p100_p2, %s3619_s15, %s102_s26  }
  0x2c   : > { %p111_p8 = por %p110_p4, %p109_p1  ;;  %p5298_p10 = scmp.eq.s32.totalorder %s3723_s17, 1 }
  0x2d   : > { %s334_s18 = sand.u32 1, %s3619_s15   ;;  %s2705_s22 = sshll.u32 %s3623_s16, 11 }
  0x2e   : > { %p3793_p12 = por %p5298_p10, %p109_p1  ;;  %s2671_s20 = sshll.u32 %s334_s18, 7 }
  0x2f   : > { %s3802_s30 = scalar_lea.hbm %s5252_s3, %s2705_s22  ;;  %s338_s23 = scalar_lea.vmem [#allocation5], %s2671_s20 }
  0x30   : > { %s346_s26 = sshll.u32 %s338_s23, 4  ;;  %p3804_p11 = pnand %p3244_p6, %p111_p8  ;;  %s3808_s26 = int_to_ptr.vmem [resolvable:$true] %s346_s26 }
  0x31   : > { %s3810_s28 = scalar_lea.sflag [#allocation6], %s334_s18  ;;  %s3523_s29 = scalar_lea.hbm %s3802_s30, 2048 }
  0x32   : > { %p3524_p13 = scmp.ne.s32.totalorder %s3802_s30, %s3523_s29  ;;  %p3525_p0 = pneg %p3804_p11 }
  0x33   : > { %s3528_s11 = scalar_lea.hbm %s5252_s3, 4096  ;;  %p3529_p7 = scmp.lt.u32.totalorder %s3802_s30, %s5252_s3 }
  0x34   : > { %p3526_p3 = pnand %p3525_p0, %p3524_p13  ;;  %p3530_p9 = scmp.lt.u32.totalorder %s3528_s11, %s3523_s29 }
  0x35   : > { %p3532_p1 = scmp.lt.u32.totalorder %s3523_s29, %s3802_s30 }
  0x36   : > { %p3527_p5 = pneg %p3526_p3  ;;  %p3531_p2 = por %p3530_p9, %p3529_p7 }
  0x38   : > { %p3533_p4 = por %p3532_p1, %p3531_p2 }
  0x3a   : > { %p3534_p6 = pnand %p3533_p4, %p3527_p5 }
  0x3c   : > { %3537 = shalt.err (!%p3534_p6)
}
  0x3d   : > { %s3538_s18 = scalar_lea.vmem %s3808_s26, 2048  ;;  %s3628_s23 = smov [#allocation5]  }
  0x3e   : > { %p3539_p8 = scmp.ne.s32.totalorder %s3808_s26, %s3538_s18  ;;  %s3543_s13 = sshll.u32 %s3628_s23, 4  ;;  %s3544_s13 = int_to_ptr.vmem [resolvable:$false] %s3543_s13 }
  0x3f   : > { %s3545_s20 = scalar_lea.vmem %s3544_s13, 4096  ;;  %p3546_p3 = scmp.lt.s32.totalorder %s3808_s26, %s3544_s13 }
  0x40   : > { %p3541_p10 = pnand %p3539_p8, %p3525_p0  ;;  %p3547_p7 = scmp.lt.s32.totalorder %s3545_s20, %s3538_s18 }
  0x42   : > { %p3542_p13 = pneg %p3541_p10  ;;  %p3548_p9 = por %p3547_p7, %p3546_p3 }
  0x44   : > { %p3549_p2 = pnand %p3548_p9, %p3542_p13 }
  0x46   : > { %3552 = shalt.err (!%p3549_p2)
}
  0x47   : > { %s3629_s29 = smov 512   ;;  %s3630_s11 = smov 32  }
  0x48   : > { %3238 = dma.hbm_to_vmem [thread:$0]  (!%p3804_p11), %s3802_s30, 2048, %s3808_s26, %s3810_s28, %s3629_s29, %s3629_s29, %s3630_s11  }
  0x49   : > { %p5301_p0 = scmp.ne.s32.totalorder %s5295_s21, 0 }
  0x4b   : > { %358 = sbr.rel (%p5301_p0) target bundleno = 1759 (0x6df), region = 60 }
  0x52   : > { %p5302_p5 = scmp.eq.s32.totalorder %s3723_s17, 0 }
  0x54   : > { %3598 = dma.done.wait (%p5302_p5), [#allocation3], 8192   ;;  %p5303_p1 = pmov %p5302_p5 }
  0x55   : > { %s3845_s22 = sand.u32 1, %s3615_s14   ;;  %p5304_p11 = scmp.ne.s32.totalorder %s5292_s19, 0 }
  0x56   : > { %3600 = vsyncadd (%p5303_p1), [#allocation3], 4294959104  ;;  %s2677_s24 = sshll.u32 %s3845_s22, 7  ;;  %s365_s18 = scalar_lea.sflag [#allocation6], %s3845_s22 }
  0x57   : > { %s3849_s23 = scalar_lea.vmem [#allocation5], %s2677_s24 }
  0x58   : > { %3602 = dma.done.wait (%p5304_p11), %s365_s18, 2048  }
  0x59   : > { %3604 = vsyncadd (%p5304_p11), %s365_s18, 4294965248  ;;  %s2679_s21 = sshll.u32 %s3723_s17, 2  ;;  %v3631_v0 = vmov 2   ;;  %v3632_v1 = vmov 0   ;;  %v3633_v4 = vmov 1   ;;  %v443_v7 = vlaneseq  ;;  %v745_v42 = vld [vmem:[#allocation2 + $0x80] sm:$0xff] }
  0x5a   : > { %3301 = vset.pattern.permute.xlu1 %v3631_v0  ;;  %3299 = vset.pattern.permute.xlu0 %v3632_v1  ;;  %p411_p4 = scmp.lt.s32.totalorder %s2679_s21, 7  ;;  %v422_v11 = vld [vmem:[%s5250_s1] sm:$0x7]  ;;  %v777_v44 = vld [vmem:[#allocation2 + $0x180] sm:$0xff]  ;;  %v747_v56 = vld [vmem:[#allocation2 + $0x90] sm:$0xff]  ;;  %s3634_s20 = smov 64  }
  0x5b   : > { %v3859_v8 = vshrl.u32 %v443_v7, 7  ;;  %v746_v43 = vld [vmem:[#allocation2 + $0x88] sm:$0xff]  ;;  %v729_v48 = vld [vmem:[#allocation2] sm:$0xff]  ;;  %v748_v59 = vld [vmem:[#allocation2 + $0x98] sm:$0xff]  ;;  %vm599_vm8 = vcmask 523264   ;;  %vm2318_vm9 = vcmask 261120  }
  0x5c   : > { %s5412_s21 = smov (!%p411_p4, %s2679_s21), 7  ;;  %v3918_v46 = vpack.c.bf16 %v746_v43, %v745_v42  ;;  %v778_v47 = vld [vmem:[#allocation2 + $0x188] sm:$0xff]  ;;  %v761_v54 = vld [vmem:[#allocation2 + $0x100] sm:$0xff]  ;;  %v779_v60 = vld [vmem:[#allocation2 + $0x190] sm:$0xff]  ;;  %s2678_s19 = sshll.u32 %s3845_s22, 5 }
  0x5d   : > { %s2680_s30 = sshll.u32 %s5412_s21, 3  ;;  %v3862_v9 = vsub.s32 0, %v3859_v8  ;;  %v3865_v10 = vsub.s32 2, %v3859_v8  ;;  %v3871_v12 = vsub.s32 1, %v3859_v8  ;;  %v730_v49 = vld [vmem:[#allocation2 + $0x8] sm:$0xff]  ;;  %v3922_v52 = vpack.c.bf16 %v778_v47, %v777_v44  ;;  %v780_v61 = vld [vmem:[#allocation2 + $0x198] sm:$0xff] }
  0x5e   : > { %s414_s28 = scalar_lea.vmem %s5249_s0, %s2680_s30  ;;  %5305 = vst [vmem:[#allocation14_spill] sm:$0xff] %v3918_v46  ;;  %v3924_v53 = vpack.c.bf16 %v730_v49, %v729_v48  ;;  %v762_v55 = vld [vmem:[#allocation2 + $0x108] sm:$0xff]  ;;  %3016 = vmatprep.subr.bf16.mxu0 %v3918_v46  ;;  %v749_v7 = vld [vmem:[#allocation2 + $0xa0] sm:$0xff]  ;;  %s409_s29 = scalar_lea.vmem [#allocation7], %s2678_s19 }
  0x5f   : > { %v418_v2 = vld [vmem:[%s414_s28] sm:$0xff]  ;;  %v419_v3 = vld [vmem:[%s414_s28 + $0x8] sm:$0xff]  ;;  %v420_v5 = vld [vmem:[%s414_s28 + $0x10] sm:$0xff]  ;;  %v3874_v13 = vrot.slane %v422_v11, %v3862_v9  ;;  %v3877_v15 = vrot.slane %v422_v11, %v3865_v10  ;;  %v470_v17 = vrot.slane %v422_v11, %v3871_v12  ;;  %5306 = vst [vmem:[#allocation15_spill] sm:$0xff] %v3922_v52  ;;  %v3927_v58 = vpack.c.bf16 %v762_v55, %v761_v54  ;;  %s2570_s11 = sshll.u32 %s409_s29, 4  ;;  %s2706_s24 = sshll.u32 %s3723_s17, 9  ;;  %s5200_s11 = int_to_ptr.vmem [resolvable:$true] %s2570_s11 }
  0x60   : > { %476 = vperm.xlu1 %3301, %v418_v2   ;;  %425 = vperm.xlu0 %3299, %v418_v2   ;;  %v421_v6 = vld [vmem:[%s414_s28 + $0x18] sm:$0xff]  ;;  %v750_v11 = vld [vmem:[#allocation2 + $0xa8] sm:$0xff]  ;;  %s5205_s21 = scalar_lea.hbm %s5259_s10, %s2706_s24  ;;  %s2557_s30 = scalar_lea.sflag [#allocation4], %s3845_s22 }
  0x61   : > { %3048 = vmatprep.subr.bf16.mxu1 %v3922_v52  ;;  %3018 = vmatpush3.bf16.msra.mxu0 %v3924_v53  ;;  %s3553_s26 = scalar_lea.vmem %s5200_s11, 512  ;;  %s3644_s17 = smov [#allocation7]  }
  0x62   : > { %3050 = vmatpush3.bf16.msra.mxu1 %v3927_v58  ;;  %p3554_p6 = scmp.ne.s32.totalorder %s5200_s11, %s3553_s26  ;;  %s3557_s27 = sshll.u32 %s3644_s17, 4  ;;  %s3558_s27 = int_to_ptr.vmem [resolvable:$false] %s3557_s27 }
  0x63   : > { %s3559_s28 = scalar_lea.vmem %s3558_s27, 1024  ;;  %p3560_p13 = scmp.lt.s32.totalorder %s5200_s11, %s3558_s27 }
  0x64   : > { %3302 = vset.pattern.permute.xlu1 %v3632_v1  ;;  %3300 = vset.pattern.permute.xlu0 %v3633_v4  ;;  %p3555_p8 = pnand %p3554_p6, %p3793_p12  ;;  %p3561_p3 = scmp.lt.s32.totalorder %s3559_s28, %s3553_s26 }
  0x65   : > { %430 = vperm.xlu1 %3302, %v419_v3   ;;  %452 = vperm.xlu0 %3300, %v418_v2   ;;  %v763_v2 = vld [vmem:[#allocation2 + $0x110] sm:$0xff] }
  0x66   : > { %p3556_p10 = pneg %p3555_p8  ;;  %p3562_p7 = por %p3561_p3, %p3560_p13 }
  0x68   : > { %p3563_p9 = pnand %p3562_p7, %p3556_p10 }
  0x69   : > { %3303 = vset.pattern.permute.xlu1 %v3633_v4  ;;  %3304 = vset.pattern.permute.xlu0 %v3631_v0 }
  0x6a   : > { %456 = vperm.xlu1 %3303, %v419_v3   ;;  %480 = vperm.xlu0 %3304, %v419_v3  }
  0x6e   : > { %3305 = vset.pattern.permute.xlu1 %v3632_v1  ;;  %484 = vperm.xlu0 %3304, %v420_v5  }
  0x6f   : > { %435 = vperm.xlu1 %3305, %v420_v5  }
  0x72   : > { %3308 = vset.pattern.permute.xlu0 %v3633_v4 }
  0x73   : > { %3306 = vset.pattern.permute.xlu1 %v3633_v4  ;;  %464 = vperm.xlu0 %3308, %v421_v6  }
  0x74   : > { %460 = vperm.xlu1 %3306, %v420_v5   ;;  %v3941_v5 = vpack.c.bf16 %v748_v59, %v747_v56 }
  0x76   : > { %3020 = vmatprep.subr.bf16.mxu0 %v3941_v5 }
  0x78   : > { %3307 = vset.pattern.permute.xlu1 %v3632_v1  ;;  %v732_v1 = vld [vmem:[#allocation2 + $0x18] sm:$0xff] }
  0x79   : > { %440 = vperm.xlu1 %3307, %v421_v6  }
  0x7d   : > { %3309 = vset.pattern.permute.xlu1 %v3631_v0  ;;  %v731_v0 = vld [vmem:[#allocation2 + $0x10] sm:$0xff] }
  0x7e   : > { %488 = vperm.xlu1 %3309, %v421_v6   ;;  %v764_v6 = vld [vmem:[#allocation2 + $0x118] sm:$0xff] }
  0xdf   : > { %v426_v14 = vpop.permute.xlu0 %425  ;;  %v477_v16 = vpop.permute.xlu1 %476 }
  0xe0   : > { %v3881_v18 = vsub.f32 %v426_v14, %v3874_v13  ;;  %v3884_v19 = vsub.f32 %v477_v16, %v3877_v15  ;;  %v3945_v16 = vpack.c.bf16 %v780_v61, %v779_v60 }
  0xe2   : > { %v499_v24 = vmul.f32 %v3881_v18, %v3881_v18  ;;  %v511_v25 = vmul.f32 %v3884_v19, %v3884_v19  ;;  %3052 = vmatprep.subr.bf16.mxu1 %v3945_v16 }
  0xe4   : > { %v453_v20 = vpop.permute.xlu0 %452  ;;  %v431_v21 = vpop.permute.xlu1 %430 }
  0xe5   : > { %v3886_v22 = vsub.f32 %v453_v20, %v470_v17  ;;  %v3889_v23 = vsub.f32 %v431_v21, %v3874_v13  ;;  %v3947_v20 = vpack.c.bf16 %v732_v1, %v731_v0  ;;  %v3949_v21 = vpack.c.bf16 %v764_v6, %v763_v2  ;;  %v752_v6 = vld [vmem:[#allocation2 + $0xb8] sm:$0xff] }
  0xe7   : > { %v503_v26 = vmul.f32 %v3886_v22, %v3886_v22  ;;  %v500_v30 = vmul.f32 %v3889_v23, %v3889_v23  ;;  %3022 = vmatpush3.bf16.msra.mxu0 %v3947_v20  ;;  %3054 = vmatpush3.bf16.msra.mxu1 %v3949_v21 }
  0xe9   : > { %v507_v27 = vadd.f32 %v503_v26, %v499_v24  ;;  %v457_v28 = vpop.permute.xlu1 %456  ;;  %v481_v29 = vpop.permute.xlu0 %480  ;;  %v781_v24 = vld [vmem:[#allocation2 + $0x1a0] sm:$0xff]  ;;  %v3952_v26 = vpack.c.bf16 %v750_v11, %v749_v7  ;;  %v783_v7 = vld [vmem:[#allocation2 + $0x1b0] sm:$0xff] }
  0xea   : > { %v3899_v31 = vsub.f32 %v457_v28, %v470_v17  ;;  %v3902_v32 = vsub.f32 %v481_v29, %v3877_v15  ;;  %v734_v28 = vld [vmem:[#allocation2 + $0x28] sm:$0xff]  ;;  %v765_v29 = vld [vmem:[#allocation2 + $0x120] sm:$0xff] }
  0xeb   : > { %v515_v33 = vadd.f32 %v511_v25, %v507_v27  ;;  %v782_v25 = vld [vmem:[#allocation2 + $0x1a8] sm:$0xff]  ;;  %3024 = vmatprep.subr.bf16.mxu0 %v3952_v26 }
  0xec   : > { %v504_v34 = vmul.f32 %v3899_v31, %v3899_v31  ;;  %v512_v35 = vmul.f32 %v3902_v32, %v3902_v32  ;;  %v3954_v27 = vpack.c.bf16 %v782_v25, %v781_v24  ;;  %v735_v24 = vld [vmem:[#allocation2 + $0x30] sm:$0xff]  ;;  %v736_v25 = vld [vmem:[#allocation2 + $0x38] sm:$0xff] }
  0xed   : > { %v3908_v36 = vadd.f32 1e-05, %v515_v33  ;;  %v485_v39 = vpop.permute.xlu0 %484 }
  0xee   : > { %v508_v37 = vadd.f32 %v504_v34, %v500_v30  ;;  %v436_v38 = vpop.permute.xlu1 %435  ;;  %v3916_v45 = vsub.f32 %v485_v39, %v3877_v15  ;;  %v766_v30 = vld [vmem:[#allocation2 + $0x128] sm:$0xff]  ;;  %3056 = vmatprep.subr.bf16.mxu1 %v3954_v27 }
  0xef   : > { %3407 = vrsqrt.f32 %v3908_v36  ;;  %v3913_v41 = vsub.f32 %v436_v38, %v3874_v13  ;;  %v3965_v39 = vpack.c.bf16 %v766_v30, %v765_v29  ;;  %vm525_vm0 = vcmp.eq.f32.partialorder %v3908_v36, inf  ;;  %v767_v30 = vld [vmem:[#allocation2 + $0x130] sm:$0xff] }
  0xf0   : > { %3409 = vrcp.f32 %v3908_v36  ;;  %v516_v40 = vadd.f32 %v512_v35, %v508_v37  ;;  %v513_v3 = vmul.f32 %v3916_v45, %v3916_v45  ;;  %v528_v48 = vand.u32 2147483648, %v3908_v36 }
  0xf1   : > { %v501_v62 = vmul.f32 %v3913_v41, %v3913_v41  ;;  %vm527_vm1 = vcmp.eq.f32.partialorder %v3908_v36, 0.0  ;;  %3058 = vmatpush3.bf16.msra.mxu1 %v3965_v39  ;;  %v4010_v29 = vpack.c.bf16 %v736_v25, %v735_v24  ;;  %v739_v24 = vld [vmem:[#allocation2 + $0x50] sm:$0xff]  ;;  %v740_v25 = vld [vmem:[#allocation2 + $0x58] sm:$0xff] }
  0xf2   : > { %v3920_v50 = vadd.f32 1e-05, %v516_v40  ;;  %v465_v51 = vpop.permute.xlu0 %464 }
  0xf3   : > { %v461_v57 = vpop.permute.xlu1 %460  ;;  %v3938_v4 = vsub.f32 %v465_v51, %v470_v17 }
  0xf4   : > { %3411 = vrsqrt.f32 %v3920_v50  ;;  %v3932_v63 = vsub.f32 %v461_v57, %v470_v17  ;;  %v733_v17 = vld [vmem:[#allocation2 + $0x20] sm:$0xff]  ;;  %vm532_vm2 = vcmp.eq.f32.partialorder %v3920_v50, inf  ;;  %v535_v56 = vand.u32 2147483648, %v3920_v50 }
  0xf5   : > { %v3958_v35 = vpack.c.bf16 %v734_v28, %v733_v17  ;;  %v506_v43 = vmul.f32 %v3938_v4, %v3938_v4  ;;  %vm534_vm3 = vcmp.eq.f32.partialorder %v3920_v50, 0.0 }
  0xf6   : > { %v505_v14 = vmul.f32 %v3932_v63, %v3932_v63 }
  0xf7   : > { %3026 = vmatpush3.bf16.msra.mxu0 %v3958_v35 }
  0xf8   : > { %v509_v33 = vadd.f32 %v505_v14, %v501_v62  ;;  %v441_v34 = vpop.permute.xlu1 %440  ;;  %v784_v14 = vld [vmem:[#allocation2 + $0x1b8] sm:$0xff] }
  0xf9   : > { %v3408_v37 = vpop.eup %3407  ;;  %v3961_v38 = vsub.f32 %v441_v34, %v3874_v13  ;;  %v4008_v28 = vpack.c.bf16 %v784_v14, %v783_v7  ;;  %v788_v14 = vld [vmem:[#allocation2 + $0x1d8] sm:$0xff] }
  0xfa   : > { %v3967_v40 = vpop.eup %3409  ;;  %v517_v42 = vadd.f32 %v513_v3, %v509_v33  ;;  %v524_v44 = vmul.f32 %v3408_v37, %v3908_v36  ;;  %v751_v3 = vld [vmem:[#allocation2 + $0xb0] sm:$0xff]  ;;  %v768_v33 = vld [vmem:[#allocation2 + $0x138] sm:$0xff] }
  0xfb   : > { %v502_v13 = vmul.f32 %v3961_v38, %v3961_v38  ;;  %v3978_v47 = vmul.f32 %v3967_v40, %v3881_v18  ;;  %v3983_v49 = vmul.f32 %v3967_v40, %v3884_v19  ;;  %v4013_v37 = vpack.c.bf16 %v768_v33, %v767_v30  ;;  %3060 = vmatprep.subr.bf16.mxu1 %v4008_v28 }
  0xfc   : > { %v3985_v51 = vadd.f32 1e-05, %v517_v42  ;;  %v526_v54 = vsel %vm525_vm0, %v3908_v36, %v524_v44  ;;  %v753_v42 = vld [vmem:[#allocation2 + $0xc0] sm:$0xff] }
  0xfd   : > { %813 = vrot.lane.b32.xlu0 %v3978_v47, %s3634_s20  ;;  %v489_v18 = vpop.permute.xlu1 %488  ;;  %v529_v55 = vsel %vm527_vm1, %v528_v48, %v526_v54  ;;  %v510_v57 = vadd.f32 %v506_v43, %v502_v13  ;;  %3062 = vmatpush3.bf16.msra.mxu1 %v4013_v37  ;;  %v754_v43 = vld [vmem:[#allocation2 + $0xc8] sm:$0xff]  ;;  %v785_v44 = vld [vmem:[#allocation2 + $0x1c0] sm:$0xff] }
  0xfe   : > { %v3412_v19 = vpop.eup %3411  ;;  %3413 = vrsqrt.f32 %v3985_v51  ;;  %v3997_v36 = vsub.f32 %v489_v18, %v3877_v15  ;;  %v571_v59 = vsub.f32 0.0, %v529_v55  ;;  %v4004_v15 = vpack.c.bf16 %v752_v6, %v751_v3  ;;  %v786_v18 = vld [vmem:[#allocation2 + $0x1c8] sm:$0xff]  ;;  %v737_v55 = vld [vmem:[#allocation2 + $0x40] sm:$0xff]  ;;  %v787_v3 = vld [vmem:[#allocation2 + $0x1d0] sm:$0xff] }
  0xff   : > { %v531_v60 = vmul.f32 %v3412_v19, %v3920_v50  ;;  %vm539_vm4 = vcmp.eq.f32.partialorder %v3985_v51, inf  ;;  %v542_v48 = vand.u32 2147483648, %v3985_v51  ;;  %v4021_v54 = vpack.c.bf16 %v754_v43, %v753_v42  ;;  %v771_v42 = vld [vmem:[#allocation2 + $0x150] sm:$0xff]  ;;  %v772_v43 = vld [vmem:[#allocation2 + $0x158] sm:$0xff] }
 0x100   : > { %v514_v61 = vmul.f32 %v3997_v36, %v3997_v36  ;;  %v575_v62 = vmul.f32 1.442695, %v571_v59  ;;  %3028 = vmatprep.subr.bf16.mxu0 %v4004_v15  ;;  %vm541_vm5 = vcmp.eq.f32.partialorder %v3985_v51, 0.0  ;;  %v4042_v33 = vpack.c.bf16 %v788_v14, %v787_v3  ;;  %v774_v14 = vld [vmem:[#allocation2 + $0x168] sm:$0xff] }
 0x101   : > { %v533_v0 = vsel %vm532_vm2, %v3920_v50, %v531_v60  ;;  %3030 = vmatpush3.bf16.msra.mxu0 %v4010_v29  ;;  %v769_v60 = vld [vmem:[#allocation2 + $0x140] sm:$0xff] }
 0x102   : > { %v518_v1 = vadd.f32 %v514_v61, %v510_v57  ;;  %3415 = vpow2.f32 %v575_v62  ;;  %v536_v2 = vsel %vm534_vm3, %v535_v56, %v533_v0  ;;  %v738_v56 = vld [vmem:[#allocation2 + $0x48] sm:$0xff]  ;;  %v4025_v57 = vpack.c.bf16 %v786_v18, %v785_v44  ;;  %3032 = vmatprep.subr.bf16.mxu0 %v4021_v54 }
 0x103   : > { %v572_v11 = vsub.f32 0.0, %v536_v2  ;;  %v4027_v59 = vpack.c.bf16 %v738_v56, %v737_v55  ;;  %v770_v61 = vld [vmem:[#allocation2 + $0x148] sm:$0xff]  ;;  %v756_v2 = vld [vmem:[#allocation2 + $0xd8] sm:$0xff]  ;;  %v4047_v44 = vpack.c.bf16 %v772_v43, %v771_v42  ;;  %v789_v55 = vld [vmem:[#allocation2 + $0x1e0] sm:$0xff] }
 0x104   : > { %v4006_v17 = vadd.f32 1e-05, %v518_v1  ;;  %v4030_v62 = vpack.c.bf16 %v770_v61, %v769_v60  ;;  %3064 = vmatprep.subr.bf16.mxu1 %v4025_v57  ;;  %v755_v1 = vld [vmem:[#allocation2 + $0xd0] sm:$0xff]  ;;  %v758_v18 = vld [vmem:[#allocation2 + $0xe8] sm:$0xff]  ;;  %v741_v61 = vld [vmem:[#allocation2 + $0x60] sm:$0xff] }
 0x105   : > { %v577_v34 = vmul.f32 1.442695, %v572_v11  ;;  %3034 = vmatpush3.bf16.msra.mxu0 %v4027_v59  ;;  %v4038_v11 = vpack.c.bf16 %v756_v2, %v755_v1  ;;  %v759_v42 = vld [vmem:[#allocation2 + $0xf0] sm:$0xff]  ;;  %v760_v43 = vld [vmem:[#allocation2 + $0xf8] sm:$0xff] }
 0x106   : > { %3417 = vrsqrt.f32 %v4006_v17  ;;  %3066 = vmatpush3.bf16.msra.mxu1 %v4030_v62  ;;  %vm546_vm6 = vcmp.eq.f32.partialorder %v4006_v17, inf  ;;  %vm548_vm7 = vcmp.eq.f32.partialorder %v4006_v17, 0.0 }
 0x107   : > { %3419 = vpow2.f32 %v577_v34  ;;  %v4044_v34 = vpack.c.bf16 %v740_v25, %v739_v24  ;;  %3036 = vmatprep.subr.bf16.mxu0 %v4038_v11  ;;  %3068 = vmatprep.subr.bf16.mxu1 %v4042_v33 }
 0x108   : > { %v3414_v13 = vpop.eup %3413  ;;  %3421 = vrcp.f32 %v3920_v50  ;;  %v790_v50 = vld [vmem:[#allocation2 + $0x1e8] sm:$0xff] }
 0x109   : > { %v538_v19 = vmul.f32 %v3414_v13, %v3985_v51  ;;  %3038 = vmatpush3.bf16.msra.mxu0 %v4044_v34  ;;  %v4059_v2 = vpack.c.bf16 %v790_v50, %v789_v55  ;;  %v792_v55 = vld [vmem:[#allocation2 + $0x1f8] sm:$0xff] }
 0x10a   : > { %3070 = vmatpush3.bf16.msra.mxu1 %v4047_v44  ;;  %v744_v50 = vld [vmem:[#allocation2 + $0x78] sm:$0xff] }
 0x10b   : > { %v540_v0 = vsel %vm539_vm4, %v3985_v51, %v538_v19  ;;  %v549_v19 = vand.u32 2147483648, %v4006_v17  ;;  %3072 = vmatprep.subr.bf16.mxu1 %v4059_v2 }
 0x10c   : > { %v4035_v6 = vpop.eup %3415  ;;  %v543_v7 = vsel %vm541_vm5, %v542_v48, %v540_v0  ;;  %v757_v48 = vld [vmem:[#allocation2 + $0xe0] sm:$0xff]  ;;  %v742_v0 = vld [vmem:[#allocation2 + $0x68] sm:$0xff] }
 0x10d   : > { %587 = vrot.lane.b32.xlu1 %v4035_v6, %s3634_s20  ;;  %v573_v30 = vsub.f32 0.0, %v543_v7  ;;  %v4056_v60 = vpack.c.bf16 %v758_v18, %v757_v48  ;;  %v4061_v3 = vpack.c.bf16 %v742_v0, %v741_v61  ;;  %v773_v7 = vld [vmem:[#allocation2 + $0x160] sm:$0xff]  ;;  %v4079_v18 = vpack.c.bf16 %v760_v43, %v759_v42 }
 0x10e   : > { %v4066_v25 = vpack.c.bf16 %v774_v14, %v773_v7  ;;  %v775_v7 = vld [vmem:[#allocation2 + $0x170] sm:$0xff]  ;;  %v776_v14 = vld [vmem:[#allocation2 + $0x178] sm:$0xff] }
 0x10f   : > { %v579_v13 = vmul.f32 1.442695, %v573_v30  ;;  %3040 = vmatprep.subr.bf16.mxu0 %v4056_v60  ;;  %5308 = vst [vmem:[#allocation17_spill] sm:$0xff] %v4079_v18 }
 0x110   : > { %v3418_v56 = vpop.eup %3417  ;;  %5307 = vst [vmem:[#allocation16_spill] sm:$0xff] %v4066_v25  ;;  %3042 = vmatpush3.bf16.msra.mxu0 %v4061_v3  ;;  %3074 = vmatpush3.bf16.msra.mxu1 %v4066_v25 }
 0x111   : > { %v545_v1 = vmul.f32 %v3418_v56, %v4006_v17  ;;  %3423 = vpow2.f32 %v579_v13  ;;  %v4063_v24 = vpop.eup %3419  ;;  %v791_v13 = vld [vmem:[#allocation2 + $0x1f0] sm:$0xff]  ;;  %3044 = vmatprep.subr.bf16.mxu0 %v4079_v18 }
 0x112   : > { %3425 = vrcp.f32 %v4006_v17  ;;  %589 = vrot.lane.b32.xlu1 %v4063_v24, %s3634_s20  ;;  %v743_v56 = vld [vmem:[#allocation2 + $0x70] sm:$0xff]  ;;  %v4081_v0 = vpack.c.bf16 %v792_v55, %v791_v13 }
 0x113   : > { %v547_v30 = vsel %vm546_vm6, %v4006_v17, %v545_v1  ;;  %v4083_v1 = vpack.c.bf16 %v744_v50, %v743_v56  ;;  %v4086_v17 = vpack.c.bf16 %v776_v14, %v775_v7  ;;  %v4127_v50 = vmul.f32 %v3967_v40, %v3886_v22 }
 0x114   : > { %v550_v48 = vsel %vm548_vm7, %v549_v19, %v547_v30  ;;  %5309 = vst [vmem:[#allocation18_spill] sm:$0xff] %v4081_v0  ;;  %3076 = vmatprep.subr.bf16.mxu1 %v4081_v0  ;;  %v3422_v30 = vpop.eup %3421 }
 0x115   : > { %v574_v61 = vsub.f32 0.0, %v550_v48  ;;  %5310 = vst [vmem:[#allocation19_spill] sm:$0xff] %v4083_v1  ;;  %5311 = vst [vmem:[#allocation20_spill] sm:$0xff] %v4086_v17  ;;  %3046 = vmatpush3.bf16.msra.mxu0 %v4083_v1  ;;  %3078 = vmatpush3.bf16.msra.mxu1 %v4086_v17  ;;  %v4099_v13 = vmul.f32 %v3422_v30, %v3889_v23  ;;  %v4113_v56 = vmul.f32 %v3422_v30, %v3899_v31 }
 0x116   : > { %3080 = vmatprep.subr.bf16.mxu0 %v3918_v46  ;;  %3112 = vmatprep.subr.bf16.mxu1 %v3922_v52  ;;  %v4134_v31 = vmul.f32 %v3422_v30, %v3902_v32  ;;  %v604_v32 = vld [vmem:[%s5254_s5] sm:$0xf] }
 0x117   : > { %v581_v19 = vmul.f32 1.442695, %v574_v61  ;;  %5312 = vst [vmem:[#allocation21_spill] sm:$0xff] %v4113_v56  ;;  %v605_v40 = vsub.f32 0.0, %v604_v32 }
 0x119   : > { %3427 = vpow2.f32 %v581_v19  ;;  %v4174_v19 = vrot.slane %v605_v40, %v3862_v9  ;;  %v4177_v30 = vrot.slane %v605_v40, %v3871_v12 }
 0x11a   : > { %3429 = vrcp.f32 %v3985_v51 }
 0x11b   : > { %v4093_v42 = vpop.eup %3423 }
 0x11c   : > { %591 = vrot.lane.b32.xlu0 %v4093_v42, %s3634_s20  ;;  %v3426_v43 = vpop.eup %3425 }
 0x11d   : > { %v4104_v48 = vmul.f32 %v3426_v43, %v3961_v38  ;;  %v4123_v38 = vmul.f32 %v3426_v43, %v3938_v4  ;;  %v4140_v61 = vmul.f32 %v3426_v43, %v3997_v36  ;;  %v606_v4 = vld [vmem:[%s5253_s4] sm:$0xf]  ;;  %v4180_v43 = vrot.slane %v605_v40, %v3865_v10 }
 0x11e   : > { %v4163_v36 = vrot.slane %v606_v4, %v3862_v9  ;;  %v4169_v7 = vrot.slane %v606_v4, %v3865_v10 }
 0x11f   : > { %5313 = vst [vmem:[#allocation22_spill] sm:$0xff] %v4123_v38  ;;  %5315 = vst [vmem:[#allocation24_spill] sm:$0xff] %v4140_v61 }
 0x120   : > { %815 = vrot.lane.b32.xlu0 %v4099_v13, %s3634_s20 }
 0x123   : > { %v4106_v55 = vpop.eup %3427 }
 0x124   : > { %819 = vrot.lane.b32.xlu0 %v4104_v48, %s3634_s20  ;;  %593 = vrot.lane.b32.xlu1 %v4106_v55, %s3634_s20  ;;  %v3430_v51 = vpop.eup %3429 }
 0x125   : > { %v4116_v23 = vmul.f32 %v3430_v51, %v3913_v41  ;;  %v4137_v41 = vmul.f32 %v3430_v51, %v3932_v63  ;;  %v4151_v22 = vmul.f32 %v3430_v51, %v3916_v45  ;;  %v622_v63 = vsub.s32 3, %v3859_v8 }
 0x126   : > { %v4166_v45 = vrot.slane %v606_v4, %v3871_v12 }
 0x127   : > { %5314 = vst [vmem:[#allocation23_spill] sm:$0xff] %v4137_v41  ;;  %v4171_v14 = vrot.slane %v606_v4, %v622_v63  ;;  %v4182_v51 = vrot.slane %v605_v40, %v622_v63 }
 0x128   : > { %1305 = vrot.lane.b32.xlu0 %v4113_v56, %s3634_s20  ;;  %817 = vrot.lane.b32.xlu1 %v4116_v23, %s3634_s20 }
 0x12c   : > { %1309 = vrot.lane.b32.xlu0 %v4123_v38, %s3634_s20  ;;  %1303 = vrot.lane.b32.xlu1 %v4127_v50, %s3634_s20 }
 0x130   : > { %1795 = vrot.lane.b32.xlu0 %v4134_v31, %s3634_s20  ;;  %1307 = vrot.lane.b32.xlu1 %v4137_v41, %s3634_s20 }
 0x134   : > { %1799 = vrot.lane.b32.xlu0 %v4140_v61, %s3634_s20  ;;  %1793 = vrot.lane.b32.xlu1 %v3983_v49, %s3634_s20 }
 0x138   : > { %1797 = vrot.lane.b32.xlu1 %v4151_v22, %s3634_s20 }
 0x17f   : > { %v588_v8 = vpop.permute.xlu1 %587 }
 0x180   : > { %v600_v32 = vsel %vm599_vm8, %v4035_v6, %v588_v8 }
 0x181   : > { %v628_v61 = vsub.f32 %v600_v32, %v4163_v36  ;;  %v629_v4 = vsub.f32 %v600_v32, %v4166_v45  ;;  %v630_v38 = vsub.f32 %v600_v32, %v4169_v7  ;;  %v631_v9 = vsub.f32 %v600_v32, %v4171_v14 }
 0x183   : > { %v644_v52 = vmul.f32 %v628_v61, %v628_v61  ;;  %v645_v41 = vmul.f32 %v629_v4, %v629_v4  ;;  %v646_v12 = vmul.f32 %v630_v38, %v630_v38  ;;  %v647_v17 = vmul.f32 %v631_v9, %v631_v9  ;;  %v814_v9 = vpop.permute.xlu0 %813 }
 0x184   : > { %v590_v8 = vpop.permute.xlu1 %589 }
 0x185   : > { %v681_v10 = vmul.f32 %v4174_v19, %v644_v52  ;;  %v682_v63 = vmul.f32 %v4177_v30, %v645_v41  ;;  %v683_v40 = vmul.f32 %v4180_v43, %v646_v12  ;;  %v684_v6 = vmul.f32 %v4182_v51, %v647_v17 }
 0x186   : > { %v601_v46 = vsel %vm599_vm8, %v4063_v24, %v590_v8 }
 0x187   : > { %v697_v1 = vmul.f32 1.442695, %v681_v10  ;;  %v699_v0 = vmul.f32 1.442695, %v682_v63  ;;  %v701_v56 = vmul.f32 1.442695, %v683_v40  ;;  %v632_v61 = vsub.f32 %v601_v46, %v4163_v36 }
 0x188   : > { %v703_v32 = vmul.f32 1.442695, %v684_v6  ;;  %v633_v38 = vsub.f32 %v601_v46, %v4166_v45  ;;  %v634_v52 = vsub.f32 %v601_v46, %v4169_v7  ;;  %v635_v41 = vsub.f32 %v601_v46, %v4171_v14 }
 0x189   : > { %3431 = vpow2.f32 %v697_v1  ;;  %v648_v4 = vmul.f32 %v632_v61, %v632_v61 }
 0x18a   : > { %3433 = vpow2.f32 %v699_v0  ;;  %v649_v17 = vmul.f32 %v633_v38, %v633_v38  ;;  %v650_v12 = vmul.f32 %v634_v52, %v634_v52  ;;  %v651_v18 = vmul.f32 %v635_v41, %v635_v41 }
 0x18b   : > { %3435 = vpow2.f32 %v701_v56  ;;  %v685_v24 = vmul.f32 %v4174_v19, %v648_v4 }
 0x18c   : > { %3437 = vpow2.f32 %v703_v32  ;;  %v686_v10 = vmul.f32 %v4177_v30, %v649_v17  ;;  %v687_v63 = vmul.f32 %v4180_v43, %v650_v12  ;;  %v688_v40 = vmul.f32 %v4182_v51, %v651_v18 }
 0x18d   : > { %v705_v6 = vmul.f32 1.442695, %v685_v24 }
 0x18e   : > { %v707_v8 = vmul.f32 1.442695, %v686_v10  ;;  %v709_v46 = vmul.f32 1.442695, %v687_v63  ;;  %v711_v1 = vmul.f32 1.442695, %v688_v40  ;;  %v592_v61 = vpop.permute.xlu0 %591 }
 0x18f   : > { %3439 = vpow2.f32 %v705_v6  ;;  %v602_v0 = vsel %vm599_vm8, %v4093_v42, %v592_v61  ;;  %v825_v42 = vsel %vm599_vm8, %v3978_v47, %v814_v9 }
 0x190   : > { %3441 = vpow2.f32 %v707_v8  ;;  %v636_v56 = vsub.f32 %v602_v0, %v4163_v36  ;;  %v637_v32 = vsub.f32 %v602_v0, %v4166_v45  ;;  %v638_v38 = vsub.f32 %v602_v0, %v4169_v7 }
 0x191   : > { %3443 = vpow2.f32 %v709_v46  ;;  %v639_v52 = vsub.f32 %v602_v0, %v4171_v14 }
 0x192   : > { %3445 = vpow2.f32 %v711_v1  ;;  %v652_v18 = vmul.f32 %v636_v56, %v636_v56  ;;  %v653_v41 = vmul.f32 %v637_v32, %v637_v32  ;;  %v654_v4 = vmul.f32 %v638_v38, %v638_v38  ;;  %v816_v17 = vpop.permute.xlu0 %815 }
 0x193   : > { %v4210_v12 = vpop.eup %3431  ;;  %v655_v24 = vmul.f32 %v639_v52, %v639_v52 }
 0x194   : > { %v4214_v10 = vpop.eup %3433  ;;  %v689_v63 = vmul.f32 %v4174_v19, %v652_v18  ;;  %v690_v40 = vmul.f32 %v4177_v30, %v653_v41  ;;  %v691_v6 = vmul.f32 %v4180_v43, %v654_v4  ;;  %v829_v8 = vmul.f32 %v4210_v12, %v825_v42 }
 0x195   : > { %v4220_v46 = vpop.eup %3435  ;;  %v692_v1 = vmul.f32 %v4182_v51, %v655_v24  ;;  %v830_v61 = vmul.f32 %v4214_v10, %v825_v42 }
 0x196   : > { %v4224_v0 = vpop.eup %3437  ;;  %v713_v47 = vmul.f32 1.442695, %v689_v63  ;;  %v715_v9 = vmul.f32 1.442695, %v690_v40  ;;  %v717_v56 = vmul.f32 1.442695, %v691_v6  ;;  %v594_v32 = vpop.permute.xlu1 %593  ;;  %v831_v52 = vmul.f32 %v4220_v46, %v825_v42 }
 0x197   : > { %v4226_v38 = vpop.permute.xlu0 %819  ;;  %v719_v18 = vmul.f32 1.442695, %v692_v1  ;;  %v603_v41 = vsel %vm599_vm8, %v4106_v55, %v594_v32  ;;  %909 = vmatprep.mubr.f32.mxu0 %v830_v61  ;;  %v832_v4 = vmul.f32 %v4224_v0, %v825_v42 }
 0x198   : > { %3447 = vpow2.f32 %v713_v47  ;;  %v640_v24 = vsub.f32 %v603_v41, %v4163_v36  ;;  %v641_v25 = vsub.f32 %v603_v41, %v4166_v45  ;;  %v642_v63 = vsub.f32 %v603_v41, %v4169_v7  ;;  %910 = vmatmul.mubr.f32.vlgmr.msra.gmra.mrb[0].mxu0 %v829_v8 }
 0x199   : > { %v4235_v40 = vpop.eup %3439  ;;  %3449 = vpow2.f32 %v715_v9  ;;  %v643_v6 = vsub.f32 %v603_v41, %v4171_v14  ;;  %994 = vmatprep.mubr.f32.mxu1 %v832_v4  ;;  %3082 = vmatpush3.bf16.msra.mxu0 %v3924_v53  ;;  %v826_v14 = vsel %vm599_vm8, %v4099_v13, %v816_v17 }
 0x19a   : > { %v4239_v55 = vpop.eup %3441  ;;  %3451 = vpow2.f32 %v717_v56  ;;  %v656_v42 = vmul.f32 %v640_v24, %v640_v24  ;;  %v657_v1 = vmul.f32 %v641_v25, %v641_v25  ;;  %v658_v61 = vmul.f32 %v642_v63, %v642_v63  ;;  %995 = vmatmul.mubr.f32.vlgmr.msra.gmra.mrb[0].mxu1 %v831_v52  ;;  %v818_v36 = vpop.permute.xlu1 %817  ;;  %3084 = vmatprep.subr.bf16.mxu0 %v3941_v5 }
 0x19b   : > { %v4242_v45 = vpop.permute.xlu0 %1305  ;;  %v4244_v7 = vpop.eup %3443  ;;  %3453 = vpow2.f32 %v719_v18  ;;  %v659_v8 = vmul.f32 %v643_v6, %v643_v6  ;;  %3114 = vmatpush3.bf16.msra.mxu1 %v3927_v58  ;;  %v834_v32 = vmul.f32 %v4239_v55, %v826_v14  ;;  %v833_v13 = vmul.f32 %v4235_v40, %v826_v14 }
 0x19c   : > { %v4249_v47 = vpop.eup %3445  ;;  %v693_v25 = vmul.f32 %v4174_v19, %v656_v42  ;;  %v694_v9 = vmul.f32 %v4177_v30, %v657_v1  ;;  %v695_v56 = vmul.f32 %v4180_v43, %v658_v61  ;;  %3116 = vmatprep.subr.bf16.mxu1 %v3945_v16  ;;  %v835_v17 = vmul.f32 %v4244_v7, %v826_v14 }
 0x19d   : > { %v696_v52 = vmul.f32 %v4182_v51, %v659_v8  ;;  %v836_v18 = vmul.f32 %v4249_v47, %v826_v14  ;;  %3086 = vmatpush3.bf16.msra.mxu0 %v3947_v20  ;;  %914 = vmatprep.mubr.f32.mxu0 %v834_v32  ;;  %v827_v63 = vsel %vm599_vm8, %v4116_v23, %v818_v36 }
 0x19e   : > { %v721_v41 = vmul.f32 1.442695, %v693_v25  ;;  %v723_v19 = vmul.f32 1.442695, %v694_v9  ;;  %v725_v4 = vmul.f32 1.442695, %v695_v56  ;;  %v1304_v30 = vpop.permute.xlu1 %1303  ;;  %3088 = vmatprep.subr.bf16.mxu0 %v3952_v26  ;;  %915 = vmatmul.mubr.f32.gmra.mrb[2].mxu0 %v833_v13 }
 0x19f   : > { %v4262_v43 = vpop.permute.xlu0 %1309  ;;  %v727_v24 = vmul.f32 1.442695, %v696_v52  ;;  %999 = vmatprep.mubr.f32.mxu1 %v836_v18  ;;  %3118 = vmatpush3.bf16.msra.mxu1 %v3949_v21 }
 0x1a0   : > { %3455 = vpow2.f32 %v721_v41  ;;  %1000 = vmatmul.mubr.f32.gmra.mrb[2].mxu1 %v835_v17  ;;  %3120 = vmatprep.subr.bf16.mxu1 %v3954_v27 }
 0x1a1   : > { %3457 = vpow2.f32 %v723_v19  ;;  %3090 = vmatpush3.bf16.msra.mxu0 %v3958_v35 }
 0x1a2   : > { %v4267_v51 = vpop.eup %3447  ;;  %3459 = vpow2.f32 %v725_v4  ;;  %v4271_v6 = vpop.permute.xlu1 %1307  ;;  %3092 = vmatprep.subr.bf16.mxu0 %v4004_v15 }
 0x1a3   : > { %v1796_v42 = vpop.permute.xlu0 %1795  ;;  %v4274_v1 = vpop.eup %3449  ;;  %3461 = vpow2.f32 %v727_v24  ;;  %3122 = vmatpush3.bf16.msra.mxu1 %v3965_v39  ;;  %v837_v14 = vmul.f32 %v4267_v51, %v827_v63 }
 0x1a4   : > { %v1806_v61 = vsel %vm599_vm8, %v4134_v31, %v1796_v42  ;;  %v4280_v8 = vpop.eup %3451  ;;  %3124 = vmatprep.subr.bf16.mxu1 %v4008_v28  ;;  %v838_v23 = vmul.f32 %v4274_v1, %v827_v63 }
 0x1a5   : > { %v4285_v36 = vmul.f32 %v4239_v55, %v1806_v61  ;;  %v4287_v25 = vpop.eup %3453  ;;  %3094 = vmatpush3.bf16.msra.mxu0 %v4010_v29  ;;  %v839_v9 = vmul.f32 %v4280_v8, %v827_v63  ;;  %v4292_v56 = vmul.f32 %v4249_v47, %v1806_v61  ;;  %v4295_v31 = vmul.f32 %v4235_v40, %v1806_v61 }
 0x1a6   : > { %919 = vmatprep.mubr.f32.mxu0 %v838_v23  ;;  %v840_v32 = vmul.f32 %v4287_v25, %v827_v63  ;;  %v1794_v52 = vpop.permute.xlu1 %1793  ;;  %3096 = vmatprep.subr.bf16.mxu0 %v4021_v54  ;;  %v4300_v18 = vmul.f32 %v4244_v7, %v1806_v61 }
 0x1a7   : > { %3126 = vmatpush3.bf16.msra.mxu1 %v4013_v37  ;;  %v4305_v13 = vsel %vm599_vm8, %v3983_v49, %v1794_v52  ;;  %920 = vmatmul.mubr.f32.gmra.mrb[4].mxu0 %v837_v14  ;;  %v828_v49 = vsel %vm599_vm8, %v4104_v48, %v4226_v38 }
 0x1a8   : > { %5316 = vst [vmem:[#allocation25_spill] sm:$0xff] %v4300_v18  ;;  %1004 = vmatprep.mubr.f32.mxu1 %v840_v32  ;;  %v4309_v17 = vmul.f32 %v4210_v12, %v4305_v13  ;;  %v4313_v41 = vmul.f32 %v4220_v46, %v4305_v13  ;;  %3128 = vmatprep.subr.bf16.mxu1 %v4025_v57  ;;  %v5328_v18 = vld [vmem:[#allocation23_spill] sm:$0xff] }
 0x1a9   : > { %1005 = vmatmul.mubr.f32.gmra.mrb[4].mxu1 %v839_v9  ;;  %3098 = vmatpush3.bf16.msra.mxu0 %v4027_v59  ;;  %v1315_v9 = vsel %vm599_vm8, %v4127_v50, %v1304_v30 }
 0x1aa   : > { %v4317_v19 = vpop.eup %3455  ;;  %v1798_v4 = vpop.permute.xlu1 %1797  ;;  %3100 = vmatprep.subr.bf16.mxu0 %v4038_v11  ;;  %v1320_v50 = vmul.f32 %v4214_v10, %v1315_v9  ;;  %v1322_v30 = vmul.f32 %v4224_v0, %v1315_v9 }
 0x1ab   : > { %v4323_v24 = vpop.eup %3457  ;;  %3130 = vmatpush3.bf16.msra.mxu1 %v4030_v62  ;;  %v1807_v63 = vsel %vm599_vm8, %v4151_v22, %v1798_v4  ;;  %v841_v42 = vmul.f32 %v4317_v19, %v828_v49 }
 0x1ac   : > { %v4329_v61 = vpop.eup %3459  ;;  %3132 = vmatprep.subr.bf16.mxu1 %v4042_v33  ;;  %v842_v14 = vmul.f32 %v4323_v24, %v828_v49  ;;  %v4334_v48 = vmul.f32 %v4274_v1, %v1807_v63  ;;  %v4337_v38 = vmul.f32 %v4287_v25, %v1807_v63  ;;  %v4346_v32 = vmul.f32 %v4267_v51, %v1807_v63 }
 0x1ad   : > { %v4339_v23 = vpop.eup %3461  ;;  %3102 = vmatpush3.bf16.msra.mxu0 %v4044_v34  ;;  %v843_v22 = vmul.f32 %v4329_v61, %v828_v49  ;;  %v4349_v52 = vmul.f32 %v4280_v8, %v1807_v63  ;;  %v5321_v63 = vld [vmem:[#allocation16_spill] sm:$0xff] }
 0x1ae   : > { %5317 = vst [vmem:[#allocation26_spill] sm:$0xff] %v4334_v48  ;;  %5318 = vst [vmem:[#allocation27_spill] sm:$0xff] %v4337_v38  ;;  %924 = vmatprep.mubr.f32.mxu0 %v842_v14  ;;  %v844_v4 = vmul.f32 %v4339_v23, %v828_v49  ;;  %3104 = vmatprep.subr.bf16.mxu0 %v4056_v60  ;;  %v5322_v49 = vld [vmem:[#allocation17_spill] sm:$0xff]  ;;  %v5326_v38 = vld [vmem:[#allocation14_spill] sm:$0xff]  ;;  %v1317_v48 = vsel %vm599_vm8, %v5328_v18, %v4271_v6 }
 0x1af   : > { %5319 = vst [vmem:[#allocation28_spill] sm:$0xff] %v4346_v32  ;;  %5320 = vst [vmem:[#allocation29_spill] sm:$0xff] %v4349_v52  ;;  %3134 = vmatpush3.bf16.msra.mxu1 %v4047_v44  ;;  %925 = vmatmul.mubr.f32.gmra.mrb[6].mxu0 %v841_v42  ;;  %v5323_v14 = vld [vmem:[#allocation21_spill] sm:$0xff]  ;;  %v5325_v52 = vld [vmem:[#allocation19_spill] sm:$0xff]  ;;  %v1319_v32 = vmul.f32 %v4210_v12, %v1315_v9 }
 0x1b0   : > { %1009 = vmatprep.mubr.f32.mxu1 %v844_v4  ;;  %3136 = vmatprep.subr.bf16.mxu1 %v4059_v2  ;;  %v1316_v42 = vsel %vm599_vm8, %v5323_v14, %v4242_v45  ;;  %v5324_v4 = vld [vmem:[#allocation18_spill] sm:$0xff]  ;;  %v5329_v45 = vld [vmem:[#allocation15_spill] sm:$0xff] }
 0x1b1   : > { %1010 = vmatmul.mubr.f32.gmra.mrb[6].mxu1 %v843_v22  ;;  %3106 = vmatpush3.bf16.msra.mxu0 %v4061_v3  ;;  %v5327_v22 = vld [vmem:[#allocation20_spill] sm:$0xff]  ;;  %v1326_v14 = vmul.f32 %v4249_v47, %v1316_v42  ;;  %v1323_v12 = vmul.f32 %v4235_v40, %v1316_v42  ;;  %v1330_v47 = vmul.f32 %v4287_v25, %v1317_v48 }
 0x1b2   : > { %1399 = vmatprep.mubr.f32.mxu0 %v1320_v50  ;;  %1484 = vmatprep.mubr.f32.mxu1 %v1322_v30  ;;  %v1324_v50 = vmul.f32 %v4239_v55, %v1316_v42  ;;  %v1321_v30 = vmul.f32 %v4220_v46, %v1315_v9  ;;  %v1328_v46 = vmul.f32 %v4274_v1, %v1317_v48 }
 0x1b3   : > { %3138 = vmatpush3.bf16.msra.mxu1 %v5321_v63  ;;  %3108 = vmatprep.subr.bf16.mxu0 %v5322_v49  ;;  %v1325_v55 = vmul.f32 %v4244_v7, %v1316_v42  ;;  %v3639_v42 = vmov 64  }
 0x1b4   : > { %3140 = vmatprep.subr.bf16.mxu1 %v5324_v4 }
 0x1b5   : > { %3110 = vmatpush3.bf16.msra.mxu0 %v5325_v52 }
 0x1b6   : > { %3144 = vmatprep.subr.bf16.mxu0 %v5326_v38  ;;  %v3638_v38 = vmov 71  }
 0x1b7   : > { %3142 = vmatpush3.bf16.msra.mxu1 %v5327_v22 }
 0x1b8   : > { %1400 = vmatmul.mubr.f32.vlgmr.msra.gmra.mrb[8].mxu0 %v1319_v32  ;;  %3176 = vmatprep.subr.bf16.mxu1 %v5329_v45 }
 0x1b9   : > { %1404 = vmatprep.mubr.f32.mxu0 %v1324_v50  ;;  %3146 = vmatpush3.bf16.msra.mxu0 %v3924_v53  ;;  %v5330_v53 = vld [vmem:[#allocation22_spill] sm:$0xff] }
 0x1ba   : > { %1485 = vmatmul.mubr.f32.vlgmr.msra.gmra.mrb[8].mxu1 %v1321_v30  ;;  %3148 = vmatprep.subr.bf16.mxu0 %v3941_v5  ;;  %v1318_v40 = vsel %vm599_vm8, %v5330_v53, %v4262_v43  ;;  %v1327_v5 = vmul.f32 %v4267_v51, %v1317_v48 }
 0x1bb   : > { %1489 = vmatprep.mubr.f32.mxu1 %v1326_v14  ;;  %3178 = vmatpush3.bf16.msra.mxu1 %v3927_v58  ;;  %v1332_v58 = vmul.f32 %v4323_v24, %v1318_v40  ;;  %v1331_v7 = vmul.f32 %v4317_v19, %v1318_v40 }
 0x1bc   : > { %1405 = vmatmul.mubr.f32.gmra.mrb[10].mxu0 %v1323_v12  ;;  %3180 = vmatprep.subr.bf16.mxu1 %v3945_v16  ;;  %v1329_v16 = vmul.f32 %v4280_v8, %v1317_v48 }
 0x1bd   : > { %1409 = vmatprep.mubr.f32.mxu0 %v1328_v46  ;;  %3150 = vmatpush3.bf16.msra.mxu0 %v3947_v20  ;;  %v1334_v20 = vmul.f32 %v4339_v23, %v1318_v40 }
 0x1be   : > { %1490 = vmatmul.mubr.f32.gmra.mrb[10].mxu1 %v1325_v55  ;;  %3152 = vmatprep.subr.bf16.mxu0 %v3952_v26  ;;  %v1333_v26 = vmul.f32 %v4329_v61, %v1318_v40 }
 0x1bf   : > { %1494 = vmatprep.mubr.f32.mxu1 %v1330_v47  ;;  %3182 = vmatpush3.bf16.msra.mxu1 %v3949_v21  ;;  %v1810_v21 = vmul.f32 %v4214_v10, %v4305_v13  ;;  %v3641_v47 = vmov 68  }
 0x1c0   : > { %1410 = vmatmul.mubr.f32.gmra.mrb[12].mxu0 %v1327_v5  ;;  %3184 = vmatprep.subr.bf16.mxu1 %v3954_v27  ;;  %v1812_v27 = vmul.f32 %v4224_v0, %v4305_v13 }
 0x1c1   : > { %1414 = vmatprep.mubr.f32.mxu0 %v1332_v58  ;;  %3154 = vmatpush3.bf16.msra.mxu0 %v3958_v35  ;;  %v1800_v35 = vpop.permute.xlu0 %1799 }
 0x1c2   : > { %1495 = vmatmul.mubr.f32.gmra.mrb[12].mxu1 %v1329_v16  ;;  %3156 = vmatprep.subr.bf16.mxu0 %v4004_v15  ;;  %v5332_v15 = vld [vmem:[#allocation24_spill] sm:$0xff] }
 0x1c3   : > { %1499 = vmatprep.mubr.f32.mxu1 %v1334_v20  ;;  %3186 = vmatpush3.bf16.msra.mxu1 %v3965_v39  ;;  %v5331_v39 = vld [vmem:[#allocation26_spill] sm:$0xff] }
 0x1c4   : > { %1415 = vmatmul.mubr.f32.gmra.mrb[14].mxu0 %v1331_v7  ;;  %3188 = vmatprep.subr.bf16.mxu1 %v4008_v28  ;;  %v1808_v28 = vsel %vm599_vm8, %v5332_v15, %v1800_v35  ;;  %v5284_v35 = vmov 70  }
 0x1c5   : > { %3158 = vmatpush3.bf16.msra.mxu0 %v4010_v29  ;;  %1889 = vmatprep.mubr.f32.mxu0 %v1810_v21  ;;  %v5333_v29 = vld [vmem:[#allocation25_spill] sm:$0xff] }
 0x1c6   : > { %1500 = vmatmul.mubr.f32.gmra.mrb[14].mxu1 %v1333_v26  ;;  %3160 = vmatprep.subr.bf16.mxu0 %v4021_v54  ;;  %v1822_v54 = vmul.f32 %v4323_v24, %v1808_v28 }
 0x1c7   : > { %3190 = vmatpush3.bf16.msra.mxu1 %v4013_v37  ;;  %1974 = vmatprep.mubr.f32.mxu1 %v1812_v27  ;;  %v5334_v37 = vld [vmem:[#allocation27_spill] sm:$0xff] }
 0x1c8   : > { %3192 = vmatprep.subr.bf16.mxu1 %v4025_v57  ;;  %v5335_v57 = vld [vmem:[#allocation28_spill] sm:$0xff] }
 0x1c9   : > { %3162 = vmatpush3.bf16.msra.mxu0 %v4027_v59  ;;  %v1824_v59 = vmul.f32 %v4339_v23, %v1808_v28 }
 0x1ca   : > { %3164 = vmatprep.subr.bf16.mxu0 %v4038_v11  ;;  %v1821_v11 = vmul.f32 %v4317_v19, %v1808_v28 }
 0x1cb   : > { %3194 = vmatpush3.bf16.msra.mxu1 %v4030_v62  ;;  %v5336_v62 = vld [vmem:[#allocation29_spill] sm:$0xff] }
 0x1cc   : > { %3196 = vmatprep.subr.bf16.mxu1 %v4042_v33  ;;  %v1823_v33 = vmul.f32 %v4329_v61, %v1808_v28 }
 0x1cd   : > { %3166 = vmatpush3.bf16.msra.mxu0 %v4044_v34  ;;  %v3635_v34 = vmov 65  }
 0x1ce   : > { %3168 = vmatprep.subr.bf16.mxu0 %v4056_v60  ;;  %3310 = vset.pattern.permute.xlu1 %v3635_v34 }
 0x1cf   : > { %3198 = vmatpush3.bf16.msra.mxu1 %v4047_v44  ;;  %3326 = vset.pattern.permute.xlu0 %v3635_v34 }
 0x1d0   : > { %3200 = vmatprep.subr.bf16.mxu1 %v4059_v2 }
 0x1d1   : > { %3170 = vmatpush3.bf16.msra.mxu0 %v4061_v3 }
 0x1d2   : > { %3172 = vmatprep.subr.bf16.mxu0 %v5322_v49 }
 0x1d3   : > { %3202 = vmatpush3.bf16.msra.mxu1 %v5321_v63 }
 0x1d4   : > { %3204 = vmatprep.subr.bf16.mxu1 %v5324_v4 }
 0x1d5   : > { %3174 = vmatpush3.bf16.msra.mxu0 %v5325_v52 }
 0x1d7   : > { %3206 = vmatpush3.bf16.msra.mxu1 %v5327_v22  ;;  %v3640_v22 = vmov 66  }
 0x1d8   : > { %1890 = vmatmul.mubr.f32.vlgmr.msra.gmra.mrb[16].mxu0 %v4309_v17  ;;  %v3637_v17 = vmov 69  }
 0x1d9   : > { %1894 = vmatprep.mubr.f32.mxu0 %v4285_v36 }
 0x1da   : > { %1975 = vmatmul.mubr.f32.vlgmr.msra.gmra.mrb[16].mxu1 %v4313_v41 }
 0x1db   : > { %1979 = vmatprep.mubr.f32.mxu1 %v4292_v56 }
 0x1dc   : > { %1895 = vmatmul.mubr.f32.gmra.mrb[18].mxu0 %v4295_v31  ;;  %v5283_v31 = vmov 67  }
 0x1dd   : > { %1899 = vmatprep.mubr.f32.mxu0 %v5331_v39 }
 0x1de   : > { %1980 = vmatmul.mubr.f32.gmra.mrb[18].mxu1 %v5333_v29 }
 0x1df   : > { %1984 = vmatprep.mubr.f32.mxu1 %v5334_v37 }
 0x1e0   : > { %1900 = vmatmul.mubr.f32.gmra.mrb[20].mxu0 %v5335_v57 }
 0x1e1   : > { %1904 = vmatprep.mubr.f32.mxu0 %v1822_v54 }
 0x1e2   : > { %1985 = vmatmul.mubr.f32.gmra.mrb[20].mxu1 %v5336_v62 }
 0x1e3   : > { %1989 = vmatprep.mubr.f32.mxu1 %v1824_v59 }
 0x1e4   : > { %1905 = vmatmul.mubr.f32.gmra.mrb[22].mxu0 %v1821_v11 }
 0x1e6   : > { %1990 = vmatmul.mubr.f32.gmra.mrb[22].mxu1 %v1823_v33 }
 0x26b   : > { %v2739_v44 = vpop.f32.mrb[0].mxu0 }
 0x26c   : > { %v2740_v60 = vpop.f32.mrb[1].mxu0 }
 0x26d   : > { %v2783_v2 = vpop.f32.mrb[0].mxu1  ;;  %v2741_v3 = vadd.f32 %v2740_v60, %v2739_v44 }
 0x26e   : > { %v2784_v10 = vpop.f32.mrb[1].mxu1 }
 0x26f   : > { %v2785_v0 = vadd.f32 %v2784_v10, %v2783_v2 }
 0x271   : > { %v4440_v43 = vadd.f32 %v2785_v0, %v2741_v3  ;;  %v2742_v51 = vpop.f32.mrb[2].mxu0 }
 0x272   : > { %v2743_v1 = vpop.f32.mrb[3].mxu0 }
 0x273   : > { %v2786_v6 = vpop.f32.mrb[2].mxu1  ;;  %1044 = vperm.xlu1 %3310, %v4440_v43   ;;  %v2744_v36 = vadd.f32 %v2743_v1, %v2742_v51 }
 0x274   : > { %v2787_v8 = vpop.f32.mrb[3].mxu1 }
 0x275   : > { %v2788_v25 = vadd.f32 %v2787_v8, %v2786_v6 }
 0x277   : > { %v4443_v56 = vadd.f32 %v2788_v25, %v2744_v36  ;;  %3311 = vset.pattern.permute.xlu1 %v5283_v31 }
 0x278   : > { %1108 = vperm.xlu1 %3311, %v4440_v43  }
 0x27a   : > { %v2745_v18 = vpop.f32.mrb[4].mxu0 }
 0x27b   : > { %v2746_v13 = vpop.f32.mrb[5].mxu0 }
 0x27c   : > { %3312 = vset.pattern.permute.xlu1 %v3637_v17  ;;  %v2789_v41 = vpop.f32.mrb[4].mxu1  ;;  %v2747_v19 = vadd.f32 %v2746_v13, %v2745_v18 }
 0x27d   : > { %1172 = vperm.xlu1 %3312, %v4440_v43   ;;  %v2790_v24 = vpop.f32.mrb[5].mxu1 }
 0x27e   : > { %v2791_v61 = vadd.f32 %v2790_v24, %v2789_v41 }
 0x280   : > { %v4449_v48 = vadd.f32 %v2791_v61, %v2747_v19 }
 0x281   : > { %3313 = vset.pattern.permute.xlu1 %v3638_v38 }
 0x282   : > { %1236 = vperm.xlu1 %3313, %v4440_v43   ;;  %1052 = vperm.xlu0 %3326, %v4449_v48   ;;  %v2748_v23 = vpop.f32.mrb[6].mxu0 }
 0x283   : > { %v2749_v9 = vpop.f32.mrb[7].mxu0 }
 0x284   : > { %v2792_v32 = vpop.f32.mrb[6].mxu1  ;;  %v2750_v52 = vadd.f32 %v2749_v9, %v2748_v23 }
 0x285   : > { %v2793_v63 = vpop.f32.mrb[7].mxu1 }
 0x286   : > { %v2794_v49 = vadd.f32 %v2793_v63, %v2792_v32  ;;  %3314 = vset.pattern.permute.xlu1 %v3639_v42  ;;  %3327 = vset.pattern.permute.xlu0 %v5283_v31 }
 0x287   : > { %1017 = vperm.xlu1 %3314, %v4440_v43   ;;  %1116 = vperm.xlu0 %3327, %v4449_v48  }
 0x288   : > { %v4458_v4 = vadd.f32 %v2794_v49, %v2750_v52 }
 0x28b   : > { %3315 = vset.pattern.permute.xlu1 %v3640_v22  ;;  %3328 = vset.pattern.permute.xlu0 %v3637_v17  ;;  %v2827_v50 = vpop.f32.mrb[8].mxu0 }
 0x28c   : > { %1084 = vperm.xlu1 %3315, %v4440_v43   ;;  %1180 = vperm.xlu0 %3328, %v4449_v48   ;;  %v2828_v30 = vpop.f32.mrb[9].mxu0 }
 0x28d   : > { %v2871_v45 = vpop.f32.mrb[8].mxu1  ;;  %v2829_v14 = vadd.f32 %v2828_v30, %v2827_v50 }
 0x28e   : > { %v2872_v12 = vpop.f32.mrb[9].mxu1 }
 0x28f   : > { %v2873_v46 = vadd.f32 %v2872_v12, %v2871_v45  ;;  %v2830_v55 = vpop.f32.mrb[10].mxu0 }
 0x290   : > { %3316 = vset.pattern.permute.xlu1 %v3641_v47  ;;  %3329 = vset.pattern.permute.xlu0 %v3638_v38  ;;  %v2831_v53 = vpop.f32.mrb[11].mxu0 }
 0x291   : > { %v4466_v40 = vadd.f32 %v2873_v46, %v2829_v14  ;;  %v2874_v5 = vpop.f32.mrb[10].mxu1  ;;  %1148 = vperm.xlu1 %3316, %v4440_v43   ;;  %1244 = vperm.xlu0 %3329, %v4449_v48   ;;  %v2832_v58 = vadd.f32 %v2831_v53, %v2830_v55 }
 0x292   : > { %v2875_v16 = vpop.f32.mrb[11].mxu1 }
 0x293   : > { %v2876_v20 = vadd.f32 %v2875_v16, %v2874_v5  ;;  %v2833_v7 = vpop.f32.mrb[12].mxu0 }
 0x294   : > { %v2834_v21 = vpop.f32.mrb[13].mxu0 }
 0x295   : > { %v4470_v26 = vadd.f32 %v2876_v20, %v2832_v58  ;;  %v2877_v27 = vpop.f32.mrb[12].mxu1  ;;  %3317 = vset.pattern.permute.xlu1 %v5284_v35  ;;  %3330 = vset.pattern.permute.xlu0 %v3639_v42  ;;  %v2835_v39 = vadd.f32 %v2834_v21, %v2833_v7 }
 0x296   : > { %v2878_v15 = vpop.f32.mrb[13].mxu1  ;;  %1212 = vperm.xlu1 %3317, %v4440_v43   ;;  %1027 = vperm.xlu0 %3330, %v4449_v48  }
 0x297   : > { %5337 = vst [vmem:[#allocation16_spill] sm:$0xff] %v4470_v26  ;;  %v2879_v28 = vadd.f32 %v2878_v15, %v2877_v27  ;;  %v2836_v29 = vpop.f32.mrb[14].mxu0 }
 0x298   : > { %v2837_v37 = vpop.f32.mrb[15].mxu0 }
 0x299   : > { %v4476_v54 = vadd.f32 %v2879_v28, %v2835_v39  ;;  %v2880_v57 = vpop.f32.mrb[14].mxu1  ;;  %v2838_v59 = vadd.f32 %v2837_v37, %v2836_v29 }
 0x29a   : > { %v2881_v62 = vpop.f32.mrb[15].mxu1  ;;  %3318 = vset.pattern.permute.xlu1 %v3635_v34  ;;  %3331 = vset.pattern.permute.xlu0 %v3640_v22 }
 0x29b   : > { %5338 = vst [vmem:[#allocation17_spill] sm:$0xff] %v4476_v54  ;;  %v2882_v11 = vadd.f32 %v2881_v62, %v2880_v57  ;;  %1092 = vperm.xlu0 %3331, %v4449_v48   ;;  %1048 = vperm.xlu1 %3318, %v4443_v56  }
 0x29d   : > { %v4482_v33 = vadd.f32 %v2882_v11, %v2838_v59 }
 0x29f   : > { %5339 = vst [vmem:[#allocation21_spill] sm:$0xff] %v4482_v33  ;;  %3332 = vset.pattern.permute.xlu0 %v3641_v47  ;;  %3319 = vset.pattern.permute.xlu1 %v5283_v31 }
 0x2a0   : > { %1156 = vperm.xlu0 %3332, %v4449_v48   ;;  %1112 = vperm.xlu1 %3319, %v4443_v56  }
 0x2a4   : > { %3333 = vset.pattern.permute.xlu0 %v5284_v35  ;;  %3320 = vset.pattern.permute.xlu1 %v3637_v17 }
 0x2a5   : > { %1220 = vperm.xlu0 %3333, %v4449_v48   ;;  %1176 = vperm.xlu1 %3320, %v4443_v56  }
 0x2a9   : > { %3334 = vset.pattern.permute.xlu0 %v3635_v34  ;;  %3321 = vset.pattern.permute.xlu1 %v3638_v38 }
 0x2aa   : > { %1240 = vperm.xlu1 %3321, %v4443_v56   ;;  %1056 = vperm.xlu0 %3334, %v4458_v4  }
 0x2ab   : > { %v2915_v44 = vpop.f32.mrb[16].mxu0 }
 0x2ac   : > { %v2916_v60 = vpop.f32.mrb[17].mxu0 }
 0x2ad   : > { %v2959_v2 = vpop.f32.mrb[16].mxu1  ;;  %v2917_v3 = vadd.f32 %v2916_v60, %v2915_v44 }
 0x2ae   : > { %v2960_v10 = vpop.f32.mrb[17].mxu1  ;;  %3322 = vset.pattern.permute.xlu1 %v3639_v42  ;;  %3336 = vset.pattern.permute.xlu0 %v3637_v17 }
 0x2af   : > { %v2961_v0 = vadd.f32 %v2960_v10, %v2959_v2  ;;  %1022 = vperm.xlu1 %3322, %v4443_v56   ;;  %1184 = vperm.xlu0 %3336, %v4458_v4   ;;  %v2918_v51 = vpop.f32.mrb[18].mxu0 }
 0x2b0   : > { %v2919_v6 = vpop.f32.mrb[19].mxu0 }
 0x2b1   : > { %v4500_v1 = vadd.f32 %v2961_v0, %v2917_v3  ;;  %v2962_v8 = vpop.f32.mrb[18].mxu1  ;;  %v2920_v36 = vadd.f32 %v2919_v6, %v2918_v51 }
 0x2b2   : > { %v2963_v25 = vpop.f32.mrb[19].mxu1 }
 0x2b3   : > { %v2964_v18 = vadd.f32 %v2963_v25, %v2962_v8  ;;  %3323 = vset.pattern.permute.xlu1 %v3640_v22  ;;  %3338 = vset.pattern.permute.xlu0 %v3639_v42  ;;  %v2921_v13 = vpop.f32.mrb[20].mxu0 }
 0x2b4   : > { %1088 = vperm.xlu1 %3323, %v4443_v56   ;;  %1032 = vperm.xlu0 %3338, %v4458_v4   ;;  %v2922_v41 = vpop.f32.mrb[21].mxu0 }
 0x2b5   : > { %v4506_v19 = vadd.f32 %v2964_v18, %v2920_v36  ;;  %v2965_v24 = vpop.f32.mrb[20].mxu1  ;;  %v2923_v61 = vadd.f32 %v2922_v41, %v2921_v13 }
 0x2b6   : > { %v2966_v23 = vpop.f32.mrb[21].mxu1 }
 0x2b7   : > { %5340 = vst [vmem:[#allocation18_spill] sm:$0xff] %v4506_v19  ;;  %v2967_v9 = vadd.f32 %v2966_v23, %v2965_v24  ;;  %v2924_v32 = vpop.f32.mrb[22].mxu0  ;;  %v4719_v23 = vld [vmem:[%s3849_s23 + $0x18] sm:$0xff] }
 0x2b8   : > { %3324 = vset.pattern.permute.xlu1 %v3641_v47  ;;  %3340 = vset.pattern.permute.xlu0 %v3641_v47  ;;  %v2925_v52 = vpop.f32.mrb[23].mxu0 }
 0x2b9   : > { %v4510_v63 = vadd.f32 %v2967_v9, %v2923_v61  ;;  %v2968_v49 = vpop.f32.mrb[22].mxu1  ;;  %1152 = vperm.xlu1 %3324, %v4443_v56   ;;  %1160 = vperm.xlu0 %3340, %v4458_v4   ;;  %v2926_v50 = vadd.f32 %v2925_v52, %v2924_v32  ;;  %v4730_v52 = vld [vmem:[%s3849_s23 + $0x30] sm:$0xff] }
 0x2ba   : > { %v2969_v30 = vpop.f32.mrb[23].mxu1 }
 0x2bb   : > { %5341 = vst [vmem:[#allocation19_spill] sm:$0xff] %v4510_v63  ;;  %v2970_v45 = vadd.f32 %v2969_v30, %v2968_v49 }
 0x2bd   : > { %v4514_v14 = vadd.f32 %v2970_v45, %v2926_v50  ;;  %3325 = vset.pattern.permute.xlu1 %v5284_v35  ;;  %3342 = vset.pattern.permute.xlu0 %v3635_v34  ;;  %v4739_v50 = vld [vmem:[%s3849_s23 + $0x38] sm:$0xff] }
 0x2be   : > { %1216 = vperm.xlu1 %3325, %v4443_v56   ;;  %1534 = vperm.xlu0 %3342, %v4466_v40  }
 0x2bf   : > { %5342 = vst [vmem:[#allocation14_spill] sm:$0xff] %v4514_v14 }
 0x2c2   : > { %3335 = vset.pattern.permute.xlu1 %v5283_v31  ;;  %3344 = vset.pattern.permute.xlu0 %v3637_v17 }
 0x2c3   : > { %1120 = vperm.xlu1 %3335, %v4458_v4   ;;  %1662 = vperm.xlu0 %3344, %v4466_v40  }
 0x2c7   : > { %3337 = vset.pattern.permute.xlu1 %v3638_v38  ;;  %3346 = vset.pattern.permute.xlu0 %v3639_v42 }
 0x2c8   : > { %1248 = vperm.xlu1 %3337, %v4458_v4   ;;  %1507 = vperm.xlu0 %3346, %v4466_v40  }
 0x2cc   : > { %3339 = vset.pattern.permute.xlu1 %v3640_v22  ;;  %3348 = vset.pattern.permute.xlu0 %v3641_v47 }
 0x2cd   : > { %1096 = vperm.xlu1 %3339, %v4458_v4   ;;  %1638 = vperm.xlu0 %3348, %v4466_v40  }
 0x2d1   : > { %3341 = vset.pattern.permute.xlu1 %v5284_v35  ;;  %3358 = vset.pattern.permute.xlu0 %v3635_v34 }
 0x2d2   : > { %1224 = vperm.xlu1 %3341, %v4458_v4   ;;  %1542 = vperm.xlu0 %3358, %v4476_v54  }
 0x2d6   : > { %3343 = vset.pattern.permute.xlu1 %v5283_v31  ;;  %3360 = vset.pattern.permute.xlu0 %v3637_v17 }
 0x2d7   : > { %1598 = vperm.xlu1 %3343, %v4466_v40   ;;  %1670 = vperm.xlu0 %3360, %v4476_v54  }
 0x2db   : > { %3345 = vset.pattern.permute.xlu1 %v3638_v38  ;;  %3362 = vset.pattern.permute.xlu0 %v3639_v42 }
 0x2dc   : > { %1726 = vperm.xlu1 %3345, %v4466_v40   ;;  %1517 = vperm.xlu0 %3362, %v4476_v54  }
 0x2e0   : > { %3347 = vset.pattern.permute.xlu1 %v3640_v22  ;;  %3364 = vset.pattern.permute.xlu0 %v3641_v47 }
 0x2e1   : > { %1574 = vperm.xlu1 %3347, %v4466_v40   ;;  %1646 = vperm.xlu0 %3364, %v4476_v54  }
 0x2e5   : > { %3349 = vset.pattern.permute.xlu1 %v5284_v35  ;;  %3365 = vset.pattern.permute.xlu0 %v5284_v35 }
 0x2e6   : > { %1702 = vperm.xlu1 %3349, %v4466_v40   ;;  %1710 = vperm.xlu0 %3365, %v4476_v54  }
 0x2ea   : > { %3350 = vset.pattern.permute.xlu1 %v3635_v34  ;;  %3366 = vset.pattern.permute.xlu0 %v3635_v34 }
 0x2eb   : > { %1538 = vperm.xlu1 %3350, %v4470_v26   ;;  %1546 = vperm.xlu0 %3366, %v4482_v33  }
 0x2ef   : > { %3351 = vset.pattern.permute.xlu1 %v5283_v31  ;;  %3367 = vset.pattern.permute.xlu0 %v5283_v31 }
 0x2f0   : > { %1602 = vperm.xlu1 %3351, %v4470_v26   ;;  %1610 = vperm.xlu0 %3367, %v4482_v33  }
 0x2f2   : > { %v4560_v12 = vpop.permute.xlu1 %1044 }
 0x2f4   : > { %3352 = vset.pattern.permute.xlu1 %v3637_v17  ;;  %3368 = vset.pattern.permute.xlu0 %v3637_v17 }
 0x2f5   : > { %1666 = vperm.xlu1 %3352, %v4470_v26   ;;  %1674 = vperm.xlu0 %3368, %v4482_v33  }
 0x2f7   : > { %v4566_v46 = vpop.permute.xlu1 %1108 }
 0x2f9   : > { %3353 = vset.pattern.permute.xlu1 %v3638_v38  ;;  %3369 = vset.pattern.permute.xlu0 %v3638_v38 }
 0x2fa   : > { %1730 = vperm.xlu1 %3353, %v4470_v26   ;;  %1738 = vperm.xlu0 %3369, %v4482_v33  }
 0x2fc   : > { %v4572_v55 = vpop.permute.xlu1 %1172 }
 0x2fe   : > { %3354 = vset.pattern.permute.xlu1 %v3639_v42  ;;  %3370 = vset.pattern.permute.xlu0 %v3639_v42 }
 0x2ff   : > { %1512 = vperm.xlu1 %3354, %v4470_v26   ;;  %1522 = vperm.xlu0 %3370, %v4482_v33  }
 0x301   : > { %v4578_v53 = vpop.permute.xlu1 %1236  ;;  %v4580_v5 = vpop.permute.xlu0 %1052 }
 0x303   : > { %3355 = vset.pattern.permute.xlu1 %v3640_v22  ;;  %3371 = vset.pattern.permute.xlu0 %v3640_v22 }
 0x304   : > { %1578 = vperm.xlu1 %3355, %v4470_v26   ;;  %1586 = vperm.xlu0 %3371, %v4482_v33  }
 0x306   : > { %v4586_v58 = vpop.permute.xlu1 %1017  ;;  %v4588_v16 = vpop.permute.xlu0 %1116 }
 0x308   : > { %3356 = vset.pattern.permute.xlu1 %v3641_v47  ;;  %3372 = vset.pattern.permute.xlu0 %v3641_v47 }
 0x309   : > { %1642 = vperm.xlu1 %3356, %v4470_v26   ;;  %1650 = vperm.xlu0 %3372, %v4482_v33  }
 0x30b   : > { %v4594_v20 = vpop.permute.xlu1 %1084  ;;  %v4596_v7 = vpop.permute.xlu0 %1180 }
 0x30d   : > { %3357 = vset.pattern.permute.xlu1 %v5284_v35  ;;  %3373 = vset.pattern.permute.xlu0 %v5284_v35 }
 0x30e   : > { %1706 = vperm.xlu1 %3357, %v4470_v26   ;;  %1714 = vperm.xlu0 %3373, %v4482_v33   ;;  %v5347_v33 = vmov 70  }
 0x310   : > { %v4602_v21 = vpop.permute.xlu1 %1148  ;;  %v4604_v27 = vpop.permute.xlu0 %1244 }
 0x312   : > { %3359 = vset.pattern.permute.xlu1 %v5283_v31  ;;  %3374 = vset.pattern.permute.xlu0 %v3635_v34 }
 0x313   : > { %1606 = vperm.xlu1 %3359, %v4476_v54   ;;  %2024 = vperm.xlu0 %3374, %v4500_v1  }
 0x315   : > { %v4610_v39 = vpop.permute.xlu1 %1212  ;;  %v4612_v15 = vpop.permute.xlu0 %1027 }
 0x317   : > { %3361 = vset.pattern.permute.xlu1 %v3638_v38  ;;  %3376 = vset.pattern.permute.xlu0 %v3637_v17 }
 0x318   : > { %1734 = vperm.xlu1 %3361, %v4476_v54   ;;  %2152 = vperm.xlu0 %3376, %v4500_v1  }
 0x31a   : > { %v4618_v28 = vpop.permute.xlu1 %1048  ;;  %v4620_v29 = vpop.permute.xlu0 %1092 }
 0x31c   : > { %3363 = vset.pattern.permute.xlu1 %v3640_v22  ;;  %3378 = vset.pattern.permute.xlu0 %v3639_v42 }
 0x31d   : > { %1582 = vperm.xlu1 %3363, %v4476_v54   ;;  %1997 = vperm.xlu0 %3378, %v4500_v1   ;;  %v4869_v54 = vld [vmem:[%s3849_s23 + $0x78] sm:$0xff] }
 0x31f   : > { %v4626_v37 = vpop.permute.xlu1 %1112  ;;  %v4628_v57 = vpop.permute.xlu0 %1156 }
 0x321   : > { %3375 = vset.pattern.permute.xlu1 %v5283_v31  ;;  %3380 = vset.pattern.permute.xlu0 %v3641_v47 }
 0x322   : > { %2088 = vperm.xlu1 %3375, %v4500_v1   ;;  %2128 = vperm.xlu0 %3380, %v4500_v1  }
 0x324   : > { %v4634_v59 = vpop.permute.xlu1 %1176  ;;  %v4636_v62 = vpop.permute.xlu0 %1220 }
 0x325   : > { %v1188_v49 = vmul.f32 %v4634_v59, %v4730_v52 }
 0x326   : > { %3377 = vset.pattern.permute.xlu1 %v3638_v38  ;;  %3390 = vset.pattern.permute.xlu0 %v3635_v34 }
 0x327   : > { %2216 = vperm.xlu1 %3377, %v4500_v1   ;;  %2032 = vperm.xlu0 %3390, %v4510_v63  }
 0x329   : > { %v4642_v11 = vpop.permute.xlu1 %1240  ;;  %v4644_v44 = vpop.permute.xlu0 %1056 }
 0x32b   : > { %3379 = vset.pattern.permute.xlu1 %v3640_v22  ;;  %3392 = vset.pattern.permute.xlu0 %v3637_v17 }
 0x32c   : > { %2064 = vperm.xlu1 %3379, %v4500_v1   ;;  %2160 = vperm.xlu0 %3392, %v4510_v63  }
 0x32e   : > { %v4650_v60 = vpop.permute.xlu1 %1022  ;;  %v4652_v2 = vpop.permute.xlu0 %1184 }
 0x330   : > { %3381 = vset.pattern.permute.xlu1 %v5284_v35  ;;  %3394 = vset.pattern.permute.xlu0 %v3639_v42 }
 0x331   : > { %2192 = vperm.xlu1 %3381, %v4500_v1   ;;  %2007 = vperm.xlu0 %3394, %v4510_v63  }
 0x333   : > { %v4658_v3 = vpop.permute.xlu1 %1088  ;;  %v4660_v10 = vpop.permute.xlu0 %1032 }
 0x335   : > { %3382 = vset.pattern.permute.xlu1 %v3635_v34  ;;  %3396 = vset.pattern.permute.xlu0 %v3641_v47 }
 0x336   : > { %2136 = vperm.xlu0 %3396, %v4510_v63   ;;  %2028 = vperm.xlu1 %3382, %v4506_v19  }
 0x338   : > { %v4666_v0 = vpop.permute.xlu1 %1152  ;;  %v4668_v51 = vpop.permute.xlu0 %1160 }
 0x33a   : > { %3398 = vset.pattern.permute.xlu0 %v3635_v34  ;;  %3383 = vset.pattern.permute.xlu1 %v5283_v31 }
 0x33b   : > { %2092 = vperm.xlu1 %3383, %v4506_v19   ;;  %2036 = vperm.xlu0 %3398, %v4514_v14  }
 0x33d   : > { %v4674_v6 = vpop.permute.xlu1 %1216  ;;  %v4676_v8 = vpop.permute.xlu0 %1534 }
 0x33f   : > { %3384 = vset.pattern.permute.xlu1 %v3637_v17  ;;  %3400 = vset.pattern.permute.xlu0 %v3637_v17 }
 0x340   : > { %2156 = vperm.xlu1 %3384, %v4506_v19   ;;  %2164 = vperm.xlu0 %3400, %v4514_v14  }
 0x342   : > { %v4682_v36 = vpop.permute.xlu1 %1120  ;;  %v4684_v34 = vpop.permute.xlu0 %1662 }
 0x344   : > { %3385 = vset.pattern.permute.xlu1 %v3638_v38  ;;  %3401 = vset.pattern.permute.xlu0 %v3638_v38 }
 0x345   : > { %2220 = vperm.xlu1 %3385, %v4506_v19   ;;  %2228 = vperm.xlu0 %3401, %v4514_v14  }
 0x347   : > { %v4690_v25 = vpop.permute.xlu1 %1248  ;;  %v4692_v18 = vpop.permute.xlu0 %1507 }
 0x349   : > { %3386 = vset.pattern.permute.xlu1 %v3639_v42  ;;  %3402 = vset.pattern.permute.xlu0 %v3639_v42 }
 0x34a   : > { %2002 = vperm.xlu1 %3386, %v4506_v19   ;;  %2012 = vperm.xlu0 %3402, %v4514_v14  }
 0x34c   : > { %v4698_v17 = vpop.permute.xlu1 %1096  ;;  %v4700_v13 = vpop.permute.xlu0 %1638 }
 0x34d   : > { %5343 = vst [vmem:[#allocation20_spill] sm:$0xff] %v4700_v13 }
 0x34e   : > { %3387 = vset.pattern.permute.xlu1 %v3640_v22  ;;  %3403 = vset.pattern.permute.xlu0 %v3640_v22 }
 0x34f   : > { %2068 = vperm.xlu1 %3387, %v4506_v19   ;;  %2076 = vperm.xlu0 %3403, %v4514_v14  }
 0x351   : > { %v4706_v41 = vpop.permute.xlu1 %1224  ;;  %v4708_v42 = vpop.permute.xlu0 %1542 }
 0x353   : > { %3388 = vset.pattern.permute.xlu1 %v3641_v47  ;;  %3404 = vset.pattern.permute.xlu0 %v3641_v47  ;;  %v1251_v47 = vmul.f32 %v4578_v53, %v4719_v23  ;;  %v1252_v53 = vmul.f32 %v4642_v11, %v4739_v50 }
 0x354   : > { %2132 = vperm.xlu1 %3388, %v4506_v19   ;;  %2140 = vperm.xlu0 %3404, %v4514_v14  }
 0x356   : > { %v4714_v24 = vpop.permute.xlu1 %1598  ;;  %v4716_v61 = vpop.permute.xlu0 %1670 }
 0x358   : > { %3389 = vset.pattern.permute.xlu1 %v5284_v35  ;;  %3405 = vset.pattern.permute.xlu0 %v5284_v35 }
 0x359   : > { %2196 = vperm.xlu1 %3389, %v4506_v19   ;;  %2204 = vperm.xlu0 %3405, %v4514_v14   ;;  %v4773_v19 = vld [vmem:[%s3849_s23 + $0x60] sm:$0xff] }
 0x35b   : > { %v1727_v9 = vpop.permute.xlu1 %1726  ;;  %v4727_v32 = vpop.permute.xlu0 %1517 }
 0x35d   : > { %3391 = vset.pattern.permute.xlu1 %v5283_v31  ;;  %1259 = vrot.lane.b32.xlu0 %v1251_v47, %s3634_s20  ;;  %v4751_v47 = vld [vmem:[%s3849_s23 + $0x40] sm:$0xff] }
 0x35e   : > { %2096 = vperm.xlu1 %3391, %v4510_v63   ;;  %3406 = vset.pattern.permute.xlu0 %v3638_v38 }
 0x360   : > { %v4741_v30 = vpop.permute.xlu1 %1574  ;;  %v4743_v45 = vpop.permute.xlu0 %1646 }
 0x361   : > { %5344 = vst [vmem:[#allocation23_spill] sm:$0xff] %v4743_v45  ;;  %1197 = vrot.lane.b32.xlu0 %v1188_v49, %s3634_s20  ;;  %v1061_v49 = vmul.f32 %v4580_v5, %v4751_v47  ;;  %v4796_v45 = vld [vmem:[%s3849_s23 + $0x8] sm:$0xff] }
 0x362   : > { %3393 = vset.pattern.permute.xlu1 %v3638_v38  ;;  %v4762_v38 = vld [vmem:[%s3849_s23 + $0x48] sm:$0xff] }
 0x363   : > { %2224 = vperm.xlu1 %3393, %v4510_v63  }
 0x365   : > { %v4753_v31 = vpop.permute.xlu1 %1702  ;;  %1261 = vrot.lane.b32.xlu0 %v1252_v53, %s3634_s20  ;;  %v4756_v59 = vpop.permute.xlu0 %1710  ;;  %v1125_v53 = vmul.f32 %v4588_v16, %v4762_v38  ;;  %v5348_v16 = vmov 67  }
 0x366   : > { %5345 = vst [vmem:[#allocation15_spill] sm:$0xff] %v4753_v31  ;;  %5346 = vst [vmem:[#allocation22_spill] sm:$0xff] %v4756_v59  ;;  %v4785_v59 = vld [vmem:[%s3849_s23] sm:$0xff] }
 0x367   : > { %3395 = vset.pattern.permute.xlu1 %v3640_v22  ;;  %v1062_v22 = vmul.f32 %v4644_v44, %v4773_v19 }
 0x368   : > { %2072 = vperm.xlu1 %3395, %v4510_v63  }
 0x369   : > { %1071 = vrot.lane.b32.xlu0 %v1061_v49, %s3634_s20 }
 0x36a   : > { %v4766_v11 = vpop.permute.xlu1 %1538  ;;  %v4768_v35 = vpop.permute.xlu0 %1546 }
 0x36c   : > { %3397 = vset.pattern.permute.xlu1 %v5347_v33  ;;  %v1741_v33 = vmul.f32 %v1727_v9, %v4719_v23  ;;  %v4804_v9 = vld [vmem:[%s3849_s23 + $0x10] sm:$0xff] }
 0x36d   : > { %2200 = vperm.xlu1 %3397, %v4510_v63   ;;  %1135 = vrot.lane.b32.xlu0 %v1125_v53, %s3634_s20  ;;  %v1059_v53 = vmul.f32 %v4560_v12, %v4785_v59 }
 0x36f   : > { %v4780_v5 = vpop.permute.xlu1 %1602  ;;  %v4782_v49 = vpop.permute.xlu0 %1610 }
 0x371   : > { %3399 = vset.pattern.permute.xlu1 %v5348_v16  ;;  %1073 = vrot.lane.b32.xlu0 %v1062_v22, %s3634_s20  ;;  %v1123_v22 = vmul.f32 %v4566_v46, %v4796_v45 }
 0x372   : > { %2100 = vperm.xlu1 %3399, %v4514_v14  }
 0x374   : > { %v1667_v44 = vpop.permute.xlu1 %1666  ;;  %v4793_v63 = vpop.permute.xlu0 %1674 }
 0x375   : > { %1749 = vrot.lane.b32.xlu0 %v1741_v33, %s3634_s20  ;;  %v1678_v16 = vmul.f32 %v1667_v44, %v4730_v52  ;;  %v1187_v33 = vmul.f32 %v4572_v55, %v4804_v9 }
 0x376   : > { %1067 = vrot.lane.b32.xlu1 %v1059_v53, %s3634_s20  ;;  %v4812_v53 = vld [vmem:[%s3849_s23 + $0x20] sm:$0xff] }
 0x379   : > { %v1731_v14 = vpop.permute.xlu1 %1730  ;;  %1687 = vrot.lane.b32.xlu0 %v1678_v16, %s3634_s20  ;;  %v1739_v12 = vpop.permute.xlu0 %1738  ;;  %v1060_v16 = vmul.f32 %v4618_v28, %v4812_v53 }
 0x37a   : > { %v1742_v26 = vmul.f32 %v1731_v14, %v4739_v50  ;;  %1131 = vrot.lane.b32.xlu1 %v1123_v22, %s3634_s20  ;;  %v1551_v14 = vmul.f32 %v4708_v42, %v4751_v47  ;;  %v4825_v22 = vld [vmem:[%s3849_s23 + $0x28] sm:$0xff] }
 0x37d   : > { %1751 = vrot.lane.b32.xlu0 %v1742_v26, %s3634_s20 }
 0x37e   : > { %v4815_v44 = vpop.permute.xlu1 %1512  ;;  %1195 = vrot.lane.b32.xlu1 %v1187_v33, %s3634_s20  ;;  %v4818_v46 = vpop.permute.xlu0 %1522  ;;  %v1124_v33 = vmul.f32 %v4626_v37, %v4825_v22  ;;  %v4852_v37 = vld [vmem:[%s3849_s23 + $0x68] sm:$0xff] }
 0x37f   : > { %5349 = vst [vmem:[#allocation26_spill] sm:$0xff] %v4815_v44  ;;  %5350 = vst [vmem:[#allocation24_spill] sm:$0xff] %v4818_v46  ;;  %v4836_v46 = vld [vmem:[%s3849_s23 + $0x50] sm:$0xff] }
 0x380   : > { %v1189_v28 = vmul.f32 %v4596_v7, %v4836_v46  ;;  %v1126_v7 = vmul.f32 %v4682_v36, %v4852_v37  ;;  %v1254_v36 = vmul.f32 %v4690_v25, %v4869_v54  ;;  %v1613_v25 = vmul.f32 %v4714_v24, %v4796_v45 }
 0x381   : > { %1561 = vrot.lane.b32.xlu0 %v1551_v14, %s3634_s20 }
 0x382   : > { %1069 = vrot.lane.b32.xlu1 %v1060_v16, %s3634_s20  ;;  %v4846_v16 = vld [vmem:[%s3849_s23 + $0x58] sm:$0xff] }
 0x383   : > { %v4829_v26 = vpop.permute.xlu1 %1578  ;;  %v4831_v55 = vpop.permute.xlu0 %1586 }
 0x384   : > { %5351 = vst [vmem:[#allocation25_spill] sm:$0xff] %v4829_v26  ;;  %5352 = vst [vmem:[#allocation27_spill] sm:$0xff] %v4831_v55  ;;  %v1253_v55 = vmul.f32 %v4604_v27, %v4846_v16 }
 0x386   : > { %1133 = vrot.lane.b32.xlu1 %v1124_v33, %s3634_s20 }
 0x388   : > { %v4841_v42 = vpop.permute.xlu1 %1642  ;;  %v4843_v14 = vpop.permute.xlu0 %1650 }
 0x389   : > { %5353 = vst [vmem:[#allocation28_spill] sm:$0xff] %v4841_v42  ;;  %5354 = vst [vmem:[#allocation29_spill] sm:$0xff] %v4843_v14  ;;  %v4862_v42 = vld [vmem:[%s3849_s23 + $0x70] sm:$0xff]  ;;  %s3643_s23 = smov 96  }
 0x38a   : > { %1199 = vrot.lane.b32.xlu1 %v1189_v28, %s3634_s20  ;;  %v1190_v27 = vmul.f32 %v4652_v2, %v4862_v42  ;;  %v1549_v2 = vmul.f32 %v4676_v8, %v4785_v59  ;;  %v1677_v8 = vmul.f32 %v4684_v34, %v4804_v9 }
 0x38d   : > { %v4854_v26 = vpop.permute.xlu1 %1706  ;;  %v4856_v33 = vpop.permute.xlu0 %1714 }
 0x38e   : > { %5355 = vst [vmem:[#allocation30_spill] sm:$0xff] %v4854_v26  ;;  %5356 = vst [vmem:[#allocation31_spill] sm:$0xff] %v4856_v33  ;;  %1263 = vrot.lane.b32.xlu1 %v1253_v55, %s3634_s20 }
 0x392   : > { %v1607_v14 = vpop.permute.xlu1 %1606  ;;  %1137 = vrot.lane.b32.xlu1 %v1126_v7, %s3634_s20  ;;  %v2025_v28 = vpop.permute.xlu0 %2024 }
 0x393   : > { %v1615_v31 = vmul.f32 %v1607_v14, %v4762_v38  ;;  %v1744_v14 = vmul.f32 %v1739_v12, %v4869_v54 }
 0x395   : > { %1625 = vrot.lane.b32.xlu0 %v1615_v31, %s3634_s20 }
 0x396   : > { %1201 = vrot.lane.b32.xlu1 %v1190_v27, %s3634_s20  ;;  %v2039_v27 = vmul.f32 %v2025_v28, %v4785_v59  ;;  %v1550_v28 = vmul.f32 %v4766_v11, %v4812_v53  ;;  %v1679_v11 = vmul.f32 %v4716_v61, %v4836_v46 }
 0x397   : > { %v1735_v55 = vpop.permute.xlu1 %1734  ;;  %v2153_v33 = vpop.permute.xlu0 %2152 }
 0x398   : > { %v1743_v26 = vmul.f32 %v1735_v55, %v4846_v16 }
 0x39a   : > { %1265 = vrot.lane.b32.xlu1 %v1254_v36, %s3634_s20  ;;  %1753 = vrot.lane.b32.xlu0 %v1743_v26, %s3634_s20 }
 0x39c   : > { %v4881_v7 = vpop.permute.xlu1 %1582  ;;  %v4883_v31 = vpop.permute.xlu0 %1997 }
 0x39d   : > { %5357 = vst [vmem:[#allocation32_spill] sm:$0xff] %v4881_v7 }
 0x39e   : > { %1557 = vrot.lane.b32.xlu1 %v1549_v2, %s3634_s20  ;;  %1755 = vrot.lane.b32.xlu0 %v1744_v14, %s3634_s20  ;;  %v2167_v2 = vmul.f32 %v2153_v33, %v4804_v9 }
 0x3a1   : > { %v2089_v55 = vpop.permute.xlu1 %2088  ;;  %v4890_v26 = vpop.permute.xlu0 %2128 }
 0x3a2   : > { %1621 = vrot.lane.b32.xlu1 %v1613_v25, %s3634_s20  ;;  %2047 = vrot.lane.b32.xlu0 %v2039_v27, %s3634_s20  ;;  %v2103_v12 = vmul.f32 %v2089_v55, %v4796_v45  ;;  %v1614_v25 = vmul.f32 %v4780_v5, %v4825_v22 }
 0x3a6   : > { %v2217_v36 = vpop.permute.xlu1 %2216  ;;  %1685 = vrot.lane.b32.xlu1 %v1677_v8, %s3634_s20  ;;  %2111 = vrot.lane.b32.xlu0 %v2103_v12, %s3634_s20  ;;  %v2033_v24 = vpop.permute.xlu0 %2032  ;;  %v1552_v8 = vmul.f32 %v4768_v35, %v4773_v19 }
 0x3a7   : > { %v2231_v27 = vmul.f32 %v2217_v36, %v4719_v23  ;;  %v1616_v36 = vmul.f32 %v4782_v49, %v4852_v37  ;;  %v2041_v49 = vmul.f32 %v2033_v24, %v4751_v47 }
 0x3aa   : > { %1559 = vrot.lane.b32.xlu1 %v1550_v28, %s3634_s20  ;;  %2175 = vrot.lane.b32.xlu0 %v2167_v2, %s3634_s20 }
 0x3ab   : > { %v4904_v14 = vpop.permute.xlu1 %2064  ;;  %v2161_v34 = vpop.permute.xlu0 %2160 }
 0x3ae   : > { %1623 = vrot.lane.b32.xlu1 %v1614_v25, %s3634_s20  ;;  %2239 = vrot.lane.b32.xlu0 %v2231_v27, %s3634_s20  ;;  %v1680_v25 = vmul.f32 %v4793_v63, %v4862_v42 }
 0x3b0   : > { %v4913_v33 = vpop.permute.xlu1 %2192  ;;  %v4915_v55 = vpop.permute.xlu0 %2007 }
 0x3b1   : > { %5358 = vst [vmem:[#allocation33_spill] sm:$0xff] %v4915_v55 }
 0x3b2   : > { %1689 = vrot.lane.b32.xlu1 %v1679_v11, %s3634_s20 }
 0x3b5   : > { %v2029_v12 = vpop.permute.xlu1 %2028  ;;  %v4920_v5 = vpop.permute.xlu0 %2136 }
 0x3b6   : > { %5359 = vst [vmem:[#allocation34_spill] sm:$0xff] %v4920_v5  ;;  %1563 = vrot.lane.b32.xlu1 %v1552_v8, %s3634_s20  ;;  %v2040_v11 = vmul.f32 %v2029_v12, %v4812_v53 }
 0x3ba   : > { %v2093_v28 = vpop.permute.xlu1 %2092  ;;  %1627 = vrot.lane.b32.xlu1 %v1616_v36, %s3634_s20  ;;  %v2037_v61 = vpop.permute.xlu0 %2036 }
 0x3bb   : > { %v2104_v2 = vmul.f32 %v2093_v28, %v4825_v22 }
 0x3bd   : > { %2113 = vrot.lane.b32.xlu0 %v2104_v2, %s3634_s20 }
 0x3be   : > { %1691 = vrot.lane.b32.xlu1 %v1680_v25, %s3634_s20 }
 0x3bf   : > { %v2157_v35 = vpop.permute.xlu1 %2156  ;;  %v2165_v27 = vpop.permute.xlu0 %2164 }
 0x3c0   : > { %v2168_v8 = vmul.f32 %v2157_v35, %v4730_v52  ;;  %v2170_v7 = vmul.f32 %v2165_v27, %v4862_v42 }
 0x3c2   : > { %2049 = vrot.lane.b32.xlu1 %v2040_v11, %s3634_s20  ;;  %2177 = vrot.lane.b32.xlu0 %v2168_v8, %s3634_s20 }
 0x3c4   : > { %v2221_v36 = vpop.permute.xlu1 %2220  ;;  %v2229_v28 = vpop.permute.xlu0 %2228 }
 0x3c5   : > { %v2232_v63 = vmul.f32 %v2221_v36, %v4739_v50  ;;  %v2234_v2 = vmul.f32 %v2229_v28, %v4869_v54 }
 0x3c6   : > { %2051 = vrot.lane.b32.xlu1 %v2041_v49, %s3634_s20 }
 0x3c7   : > { %2241 = vrot.lane.b32.xlu0 %v2232_v63, %s3634_s20 }
 0x3c9   : > { %v4940_v25 = vpop.permute.xlu1 %2002  ;;  %v4942_v12 = vpop.permute.xlu0 %2012 }
 0x3ca   : > { %5360 = vst [vmem:[#allocation35_spill] sm:$0xff] %v4940_v25  ;;  %5361 = vst [vmem:[#allocation36_spill] sm:$0xff] %v4942_v12 }
 0x3cb   : > { %2245 = vrot.lane.b32.xlu0 %v2234_v2, %s3634_s20  ;;  %v2169_v2 = vmul.f32 %v2161_v34, %v4836_v46 }
 0x3ce   : > { %v4945_v35 = vpop.permute.xlu1 %2068  ;;  %v4947_v11 = vpop.permute.xlu0 %2076 }
 0x3cf   : > { %5362 = vst [vmem:[#allocation37_spill] sm:$0xff] %v4945_v35  ;;  %5363 = vst [vmem:[#allocation38_spill] sm:$0xff] %v4947_v11 }
 0x3d3   : > { %v4949_v24 = vpop.permute.xlu1 %2132  ;;  %v4951_v8 = vpop.permute.xlu0 %2140 }
 0x3d4   : > { %5364 = vst [vmem:[#allocation39_spill] sm:$0xff] %v4949_v24  ;;  %5365 = vst [vmem:[#allocation40_spill] sm:$0xff] %v4951_v8  ;;  %v2042_v8 = vmul.f32 %v2037_v61, %v4773_v19 }
 0x3d8   : > { %v4953_v36 = vpop.permute.xlu1 %2196  ;;  %v4955_v49 = vpop.permute.xlu0 %2204 }
 0x3d9   : > { %5366 = vst [vmem:[#allocation41_spill] sm:$0xff] %v4953_v36  ;;  %5367 = vst [vmem:[#allocation42_spill] sm:$0xff] %v4955_v49 }
 0x3dc   : > { %v1260_v63 = vpop.permute.xlu0 %1259 }
 0x3dd   : > { %v2097_v28 = vpop.permute.xlu1 %2096 }
 0x3de   : > { %v2105_v5 = vmul.f32 %v2097_v28, %v4762_v38 }
 0x3e0   : > { %2115 = vrot.lane.b32.xlu1 %v2105_v5, %s3634_s20  ;;  %v4959_v12 = vpop.permute.xlu0 %1197  ;;  %v1035_v5 = vmul.f32 %v4586_v58, %v4785_v59 }
 0x3e2   : > { %v2225_v35 = vpop.permute.xlu1 %2224  ;;  %v1039_v61 = vadd.f32 %v1035_v5, %v4440_v43 }
 0x3e3   : > { %v2233_v43 = vmul.f32 %v2225_v35, %v4846_v16 }
 0x3e4   : > { %2179 = vrot.lane.b32.xlu1 %v2169_v2, %s3634_s20  ;;  %v4963_v11 = vpop.permute.xlu0 %1261 }
 0x3e7   : > { %v4966_v36 = vpop.permute.xlu1 %2072 }
 0x3e8   : > { %5368 = vst [vmem:[#allocation43_spill] sm:$0xff] %v4966_v36  ;;  %2053 = vrot.lane.b32.xlu1 %v2042_v8, %s3634_s20  ;;  %v1072_v49 = vpop.permute.xlu0 %1071  ;;  %v1099_v8 = vmul.f32 %v4594_v20, %v4796_v45 }
 0x3ec   : > { %v4969_v24 = vpop.permute.xlu1 %2200  ;;  %v1136_v28 = vpop.permute.xlu0 %1135 }
 0x3ed   : > { %5369 = vst [vmem:[#allocation44_spill] sm:$0xff] %v4969_v24  ;;  %v1037_v24 = vmul.f32 %v4612_v15, %v4751_v47  ;;  %v1036_v15 = vmul.f32 %v4650_v60, %v4812_v53  ;;  %v1100_v60 = vmul.f32 %v4658_v3, %v4825_v22  ;;  %v1164_v3 = vmul.f32 %v4666_v0, %v4730_v52 }
 0x3ef   : > { %v1041_v5 = vadd.f32 %v1037_v24, %v4449_v48  ;;  %v1040_v24 = vadd.f32 %v1036_v15, %v4443_v56  ;;  %v1038_v56 = vmul.f32 %v4660_v10, %v4773_v19  ;;  %v1228_v15 = vmul.f32 %v4674_v6, %v4739_v50 }
 0x3f0   : > { %v1074_v55 = vpop.permute.xlu0 %1073  ;;  %v1229_v10 = vmul.f32 %v4636_v62, %v4846_v16 }
 0x3f1   : > { %v2101_v34 = vpop.permute.xlu1 %2100  ;;  %v1081_v13 = vadd.f32 %v1072_v49, %v1041_v5 }
 0x3f2   : > { %v2106_v25 = vmul.f32 %v2101_v34, %v4852_v37 }
 0x3f4   : > { %2117 = vrot.lane.b32.xlu1 %v2106_v25, %s3634_s20  ;;  %v4975_v2 = vpop.permute.xlu0 %1749 }
 0x3f5   : > { %5370 = vst [vmem:[#allocation45_spill] sm:$0xff] %v4975_v2  ;;  %v1068_v36 = vpop.permute.xlu1 %1067  ;;  %v1163_v2 = vmul.f32 %v4602_v21, %v4804_v9  ;;  %v1101_v21 = vmul.f32 %v4620_v29, %v4762_v38 }
 0x3f6   : > { %v1079_v58 = vadd.f32 %v1068_v36, %v1039_v61  ;;  %v1227_v61 = vmul.f32 %v4610_v39, %v4719_v23 }
 0x3f8   : > { %2181 = vrot.lane.b32.xlu1 %v2170_v7, %s3634_s20  ;;  %v4984_v44 = vpop.permute.xlu0 %1687  ;;  %v1103_v34 = vadd.f32 %v1099_v8, %v1079_v58  ;;  %v1105_v8 = vadd.f32 %v1101_v21, %v1081_v13  ;;  %v1165_v13 = vmul.f32 %v4628_v57, %v4836_v46 }
 0x3f9   : > { %v1132_v25 = vpop.permute.xlu1 %1131 }
 0x3fa   : > { %v1143_v20 = vadd.f32 %v1132_v25, %v1103_v34  ;;  %v1145_v25 = vadd.f32 %v1136_v28, %v1105_v8  ;;  %v1102_v8 = vmul.f32 %v4698_v17, %v4852_v37 }
 0x3fc   : > { %2243 = vrot.lane.b32.xlu1 %v2233_v43, %s3634_s20  ;;  %v1167_v27 = vadd.f32 %v1163_v2, %v1143_v20  ;;  %v4993_v7 = vpop.permute.xlu0 %1751  ;;  %v1169_v28 = vadd.f32 %v1165_v13, %v1145_v25 }
 0x3fd   : > { %v1196_v36 = vpop.permute.xlu1 %1195 }
 0x3fe   : > { %v1207_v35 = vadd.f32 %v1196_v36, %v1167_v27  ;;  %v1042_v27 = vadd.f32 %v1038_v56, %v4458_v4  ;;  %v2015_v4 = vmul.f32 %v4883_v31, %v4785_v59  ;;  %v1525_v56 = vmul.f32 %v4692_v18, %v4785_v59 }
 0x400   : > { %v1231_v48 = vadd.f32 %v1227_v61, %v1207_v35  ;;  %v5004_v34 = vpop.permute.xlu0 %1561  ;;  %v1082_v61 = vadd.f32 %v1074_v55, %v1042_v27  ;;  %v2207_v27 = vmul.f32 %v4913_v33, %v4719_v23  ;;  %v5372_v33 = vld [vmem:[#allocation26_spill] sm:$0xff] }
 0x401   : > { %v1070_v58 = vpop.permute.xlu1 %1069 }
 0x402   : > { %v5002_v49 = vadd.f32 %v1260_v63, %v1231_v48  ;;  %v1080_v2 = vadd.f32 %v1070_v58, %v1040_v24  ;;  %v1106_v62 = vadd.f32 %v1102_v8, %v1082_v61 }
 0x404   : > { %1279 = vrot.lane.b32.xlu1 %v5002_v49, %s3643_s23  ;;  %v1104_v39 = vadd.f32 %v1100_v60, %v1080_v2  ;;  %v2019_v60 = vadd.f32 %v2015_v4, %v4500_v1  ;;  %v2079_v2 = vmul.f32 %v4904_v14, %v4796_v45 }
 0x405   : > { %v1134_v29 = vpop.permute.xlu1 %1133 }
 0x406   : > { %v1144_v63 = vadd.f32 %v1134_v29, %v1104_v39  ;;  %v1230_v29 = vmul.f32 %v4706_v41, %v4869_v54  ;;  %v1529_v41 = vadd.f32 %v1525_v56, %v4466_v40  ;;  %v5371_v40 = vld [vmem:[#allocation20_spill] sm:$0xff] }
 0x407   : > { %v5014_v43 = vpop.permute.xlu0 %1625 }
 0x408   : > { %v1168_v5 = vadd.f32 %v1164_v3, %v1144_v63  ;;  %v2143_v63 = vmul.f32 %v4890_v26, %v4804_v9 }
 0x409   : > { %v1200_v20 = vpop.permute.xlu1 %1199 }
 0x40a   : > { %v1208_v36 = vadd.f32 %v4959_v12, %v1168_v5  ;;  %v1209_v57 = vadd.f32 %v1200_v20, %v1169_v28  ;;  %v1166_v12 = vmul.f32 %v4668_v51, %v4862_v42 }
 0x40c   : > { %v1232_v21 = vadd.f32 %v1228_v15, %v1208_v36  ;;  %v5022_v0 = vpop.permute.xlu0 %1753  ;;  %v1233_v48 = vadd.f32 %v1229_v10, %v1209_v57  ;;  %v1589_v36 = vmul.f32 %v4741_v30, %v4796_v45  ;;  %v1527_v10 = vmul.f32 %v4727_v32, %v4751_v47  ;;  %v5373_v45 = vld [vmem:[#allocation17_spill] sm:$0xff]  ;;  %v5374_v32 = vld [vmem:[#allocation15_spill] sm:$0xff] }
 0x40d   : > { %v1264_v35 = vpop.permute.xlu1 %1263  ;;  %v1526_v30 = vmul.f32 %v5372_v33, %v4812_v53 }
 0x40e   : > { %v5027_v24 = vadd.f32 %v4963_v11, %v1232_v21  ;;  %v5037_v58 = vadd.f32 %v1264_v35, %v1233_v48  ;;  %v1653_v48 = vmul.f32 %v5371_v40, %v4804_v9 }
 0x410   : > { %1281 = vrot.lane.b32.xlu1 %v5027_v24, %s3643_s23  ;;  %v5033_v6 = vpop.permute.xlu0 %1755 }
 0x411   : > { %v1138_v55 = vpop.permute.xlu1 %1137 }
 0x412   : > { %v1146_v17 = vadd.f32 %v1138_v55, %v1106_v62  ;;  %v1531_v62 = vadd.f32 %v1527_v10, %v5373_v45  ;;  %v5385_v45 = vld [vmem:[#allocation27_spill] sm:$0xff] }
 0x414   : > { %1283 = vrot.lane.b32.xlu1 %v5037_v58, %s3643_s23  ;;  %v2048_v11 = vpop.permute.xlu0 %2047  ;;  %v1170_v31 = vadd.f32 %v1166_v12, %v1146_v17  ;;  %v1717_v17 = vmul.f32 %v5374_v32, %v4719_v23 }
 0x415   : > { %v2059_v25 = vadd.f32 %v2048_v11, %v2019_v60  ;;  %v1202_v39 = vpop.permute.xlu1 %1201  ;;  %v1571_v60 = vadd.f32 %v5004_v34, %v1531_v62  ;;  %v1592_v62 = vmul.f32 %v5385_v45, %v4852_v37 }
 0x416   : > { %v1210_v13 = vadd.f32 %v1202_v39, %v1170_v31  ;;  %v5375_v31 = vld [vmem:[#allocation32_spill] sm:$0xff] }
 0x417   : > { %v2083_v51 = vadd.f32 %v2079_v2, %v2059_v25  ;;  %v1591_v9 = vmul.f32 %v5375_v31, %v4762_v38  ;;  %v5376_v25 = vld [vmem:[#allocation16_spill] sm:$0xff] }
 0x418   : > { %v2112_v3 = vpop.permute.xlu0 %2111  ;;  %v1234_v1 = vadd.f32 %v1230_v29, %v1210_v13  ;;  %v1530_v39 = vadd.f32 %v1526_v30, %v5376_v25  ;;  %v5377_v13 = vld [vmem:[#allocation25_spill] sm:$0xff] }
 0x419   : > { %v2123_v5 = vadd.f32 %v2112_v3, %v2083_v51  ;;  %v1266_v28 = vpop.permute.xlu1 %1265  ;;  %v1590_v51 = vmul.f32 %v5377_v13, %v4825_v22  ;;  %v1595_v56 = vadd.f32 %v1591_v9, %v1571_v60  ;;  %v5378_v3 = vld [vmem:[#allocation45_spill] sm:$0xff] }
 0x41a   : > { %v5050_v20 = vadd.f32 %v1266_v28, %v1234_v1  ;;  %v5379_v28 = vld [vmem:[#allocation23_spill] sm:$0xff]  ;;  %v5386_v60 = vld [vmem:[#allocation29_spill] sm:$0xff] }
 0x41b   : > { %v2147_v14 = vadd.f32 %v2143_v63, %v2123_v5  ;;  %v1635_v23 = vadd.f32 %v5014_v43, %v1595_v56  ;;  %v5382_v43 = vld [vmem:[#allocation30_spill] sm:$0xff]  ;;  %v5389_v56 = vld [vmem:[#allocation33_spill] sm:$0xff] }
 0x41c   : > { %1285 = vrot.lane.b32.xlu1 %v5050_v20, %s3643_s23  ;;  %v2176_v15 = vpop.permute.xlu0 %2175  ;;  %v1718_v10 = vmul.f32 %v5382_v43, %v4739_v50 }
 0x41d   : > { %v2187_v18 = vadd.f32 %v2176_v15, %v2147_v14  ;;  %v1558_v59 = vpop.permute.xlu1 %1557  ;;  %v1655_v14 = vmul.f32 %v5379_v28, %v4836_v46  ;;  %v5380_v15 = vld [vmem:[#allocation28_spill] sm:$0xff]  ;;  %v5391_v28 = vld [vmem:[#allocation37_spill] sm:$0xff] }
 0x41e   : > { %v1569_v26 = vadd.f32 %v1558_v59, %v1529_v41  ;;  %v1654_v41 = vmul.f32 %v5380_v15, %v4730_v52 }
 0x41f   : > { %v2211_v57 = vadd.f32 %v2207_v27, %v2187_v18  ;;  %v5381_v18 = vld [vmem:[#allocation24_spill] sm:$0xff] }
 0x420   : > { %v2240_v61 = vpop.permute.xlu0 %2239  ;;  %v1593_v21 = vadd.f32 %v1589_v36, %v1569_v26  ;;  %v1528_v59 = vmul.f32 %v5381_v18, %v4773_v19  ;;  %v1659_v26 = vadd.f32 %v1655_v14, %v1635_v23  ;;  %v5390_v23 = vld [vmem:[#allocation18_spill] sm:$0xff] }
 0x421   : > { %v5061_v35 = vadd.f32 %v2240_v61, %v2211_v57  ;;  %v1622_v8 = vpop.permute.xlu1 %1621 }
 0x422   : > { %v1633_v4 = vadd.f32 %v1622_v8, %v1593_v21  ;;  %v5383_v8 = vld [vmem:[#allocation22_spill] sm:$0xff] }
 0x423   : > { %2259 = vrot.lane.b32.xlu1 %v5061_v35, %s3643_s23  ;;  %v1719_v40 = vmul.f32 %v5383_v8, %v4846_v16 }
 0x424   : > { %v1657_v55 = vadd.f32 %v1653_v48, %v1633_v4  ;;  %v5384_v4 = vld [vmem:[#allocation21_spill] sm:$0xff] }
 0x425   : > { %v1686_v12 = vpop.permute.xlu1 %1685  ;;  %v1532_v33 = vadd.f32 %v1528_v59, %v5384_v4 }
 0x426   : > { %v1697_v11 = vadd.f32 %v1686_v12, %v1657_v55 }
 0x428   : > { %v1721_v2 = vadd.f32 %v1717_v17, %v1697_v11  ;;  %v1656_v11 = vmul.f32 %v5386_v60, %v4862_v42 }
 0x429   : > { %v1560_v29 = vpop.permute.xlu1 %1559 }
 0x42a   : > { %v5079_v1 = vadd.f32 %v5378_v3, %v1721_v2  ;;  %v1570_v63 = vadd.f32 %v1560_v29, %v1530_v39  ;;  %v5387_v2 = vld [vmem:[#allocation35_spill] sm:$0xff]  ;;  %v2017_v3 = vmul.f32 %v5389_v56, %v4751_v47  ;;  %v2310_v56 = vld [vmem:[%s5255_s6 + $0x18] sm:$0xff] }
 0x42b   : > { %v2016_v25 = vmul.f32 %v5387_v2, %v4812_v53  ;;  %v5388_v29 = vld [vmem:[#allocation31_spill] sm:$0xff]  ;;  %v2080_v53 = vmul.f32 %v5391_v28, %v4825_v22  ;;  %v5402_v28 = vld [vmem:[#allocation42_spill] sm:$0xff] }
 0x42c   : > { %1769 = vrot.lane.b32.xlu0 %v5079_v1, %s3643_s23  ;;  %v1594_v34 = vadd.f32 %v1590_v51, %v1570_v63  ;;  %v1720_v13 = vmul.f32 %v5388_v29, %v4869_v54  ;;  %v5393_v47 = vld [vmem:[#allocation39_spill] sm:$0xff] }
 0x42d   : > { %v1624_v5 = vpop.permute.xlu1 %1623 }
 0x42e   : > { %v1634_v27 = vadd.f32 %v1624_v5, %v1594_v34 }
 0x42f   : > { %v2114_v34 = vpop.permute.xlu0 %2113 }
 0x430   : > { %v1658_v36 = vadd.f32 %v1654_v41, %v1634_v27  ;;  %v5392_v27 = vld [vmem:[#allocation19_spill] sm:$0xff] }
 0x431   : > { %v1690_v57 = vpop.permute.xlu1 %1689  ;;  %v2021_v18 = vadd.f32 %v2017_v3, %v5392_v27 }
 0x432   : > { %v1698_v61 = vadd.f32 %v4984_v44, %v1658_v36  ;;  %v1699_v21 = vadd.f32 %v1690_v57, %v1659_v26  ;;  %v2144_v36 = vmul.f32 %v5393_v47, %v4730_v52  ;;  %v5394_v26 = vld [vmem:[#allocation43_spill] sm:$0xff] }
 0x433   : > { %v2081_v57 = vmul.f32 %v5394_v26, %v4762_v38 }
 0x434   : > { %v1722_v48 = vadd.f32 %v1718_v10, %v1698_v61  ;;  %v1723_v55 = vadd.f32 %v1719_v40, %v1699_v21  ;;  %v2178_v22 = vpop.permute.xlu0 %2177  ;;  %v5395_v21 = vld [vmem:[#allocation41_spill] sm:$0xff] }
 0x435   : > { %v1564_v30 = vpop.permute.xlu1 %1563  ;;  %v2208_v8 = vmul.f32 %v5395_v21, %v4739_v50  ;;  %v5398_v50 = vld [vmem:[#allocation44_spill] sm:$0xff] }
 0x436   : > { %v1572_v12 = vadd.f32 %v1564_v30, %v1532_v33  ;;  %v5099_v32 = vadd.f32 %v4993_v7, %v1722_v48  ;;  %v5106_v31 = vadd.f32 %v5022_v0, %v1723_v55  ;;  %v2020_v0 = vadd.f32 %v2016_v25, %v5390_v23  ;;  %v5396_v30 = vld [vmem:[#allocation34_spill] sm:$0xff]  ;;  %v5401_v23 = vld [vmem:[#allocation40_spill] sm:$0xff] }
 0x437   : > { %v2145_v38 = vmul.f32 %v5396_v30, %v4836_v46  ;;  %v2308_v46 = vld [vmem:[%s5255_s6 + $0x8] sm:$0xff] }
 0x438   : > { %1771 = vrot.lane.b32.xlu0 %v5099_v32, %s3643_s23  ;;  %v1596_v44 = vadd.f32 %v1592_v62, %v1572_v12  ;;  %v5397_v62 = vld [vmem:[#allocation36_spill] sm:$0xff] }
 0x439   : > { %v1628_v17 = vpop.permute.xlu1 %1627  ;;  %v2242_v4 = vpop.permute.xlu0 %2241  ;;  %v2018_v55 = vmul.f32 %v5397_v62, %v4773_v19  ;;  %v5400_v19 = vld [vmem:[#allocation38_spill] sm:$0xff] }
 0x43a   : > { %v1636_v9 = vadd.f32 %v1628_v17, %v1596_v44  ;;  %v2209_v17 = vmul.f32 %v5398_v50, %v4846_v16  ;;  %v2309_v16 = vld [vmem:[%s5255_s6 + $0x10] sm:$0xff] }
 0x43b   : > { %v3211_v3 = vpack.c.bf16 %v2310_v56, %v2309_v16 }
 0x43c   : > { %1773 = vrot.lane.b32.xlu0 %v5106_v31, %s3643_s23  ;;  %v1660_v7 = vadd.f32 %v1656_v11, %v1636_v9  ;;  %v5399_v11 = vld [vmem:[#allocation14_spill] sm:$0xff] }
 0x43d   : > { %v1692_v39 = vpop.permute.xlu1 %1691  ;;  %v2022_v9 = vadd.f32 %v2018_v55, %v5399_v11  ;;  %v2246_v27 = vpop.permute.xlu0 %2245 }
 0x43e   : > { %v1700_v51 = vadd.f32 %v1692_v39, %v1660_v7  ;;  %v2307_v7 = vld [vmem:[%s5255_s6] sm:$0xff]  ;;  %v2082_v39 = vmul.f32 %v5400_v19, %v4852_v37  ;;  %v2146_v37 = vmul.f32 %v5401_v23, %v4862_v42 }
 0x440   : > { %v1724_v63 = vadd.f32 %v1720_v13, %v1700_v51  ;;  %v3207_v13 = vpack.c.bf16 %v2308_v46, %v2307_v7 }
 0x441   : > { %v2050_v5 = vpop.permute.xlu1 %2049 }
 0x442   : > { %v5120_v14 = vadd.f32 %v5033_v6, %v1724_v63  ;;  %v2060_v15 = vadd.f32 %v2050_v5, %v2020_v0  ;;  %3208 = vmatprep.subr.bf16.mxu0 %v3207_v13 }
 0x443   : > { %3210 = vmatpush3.bf16.msra.mxu0 %v3207_v13 }
 0x444   : > { %v2084_v41 = vadd.f32 %v2080_v53, %v2060_v15  ;;  %1775 = vrot.lane.b32.xlu0 %v5120_v14, %s3643_s23  ;;  %3212 = vmatprep.subr.bf16.mxu0 %v3211_v3  ;;  %v2210_v53 = vmul.f32 %v5402_v28, %v4869_v54  ;;  %v2447_v28 = vld [vmem:[%s5257_s8 + $0x18] sm:$0xff] }
 0x445   : > { %v2052_v59 = vpop.permute.xlu1 %2051 }
 0x446   : > { %v2124_v43 = vadd.f32 %v2114_v34, %v2084_v41  ;;  %v2061_v10 = vadd.f32 %v2052_v59, %v2021_v18 }
 0x447   : > { %3214 = vmatpush3.bf16.msra.mxu0 %v3211_v3 }
 0x448   : > { %v2148_v61 = vadd.f32 %v2144_v36, %v2124_v43  ;;  %v2085_v6 = vadd.f32 %v2081_v57, %v2061_v10 }
 0x44a   : > { %v2188_v40 = vadd.f32 %v2178_v22, %v2148_v61 }
 0x44c   : > { %v2212_v48 = vadd.f32 %v2208_v8, %v2188_v40 }
 0x44e   : > { %v5131_v33 = vadd.f32 %v2242_v4, %v2212_v48 }
 0x450   : > { %2261 = vrot.lane.b32.xlu0 %v5131_v33, %s3643_s23 }
 0x452   : > { %v2116_v52 = vpop.permute.xlu1 %2115 }
 0x453   : > { %v2125_v45 = vadd.f32 %v2116_v52, %v2085_v6 }
 0x455   : > { %v2149_v12 = vadd.f32 %v2145_v38, %v2125_v45 }
 0x456   : > { %v2180_v44 = vpop.permute.xlu1 %2179 }
 0x457   : > { %v2189_v60 = vadd.f32 %v2180_v44, %v2149_v12 }
 0x459   : > { %v2213_v2 = vadd.f32 %v2209_v17, %v2189_v60 }
 0x45a   : > { %v2054_v25 = vpop.permute.xlu1 %2053 }
 0x45b   : > { %v2062_v29 = vadd.f32 %v2054_v25, %v2022_v9 }
 0x45d   : > { %v2086_v51 = vadd.f32 %v2082_v39, %v2062_v29 }
 0x466   : > { %v2118_v63 = vpop.permute.xlu1 %2117 }
 0x467   : > { %v2126_v0 = vadd.f32 %v2118_v63, %v2086_v51 }
 0x469   : > { %v2150_v34 = vadd.f32 %v2146_v37, %v2126_v0  ;;  %v2444_v37 = vld [vmem:[%s5257_s8] sm:$0xff]  ;;  %v2445_v0 = vld [vmem:[%s5257_s8 + $0x8] sm:$0xff] }
 0x46a   : > { %v2182_v5 = vpop.permute.xlu1 %2181 }
 0x46b   : > { %v2190_v15 = vadd.f32 %v2182_v5, %v2150_v34  ;;  %v3215_v34 = vpack.c.bf16 %v2445_v0, %v2444_v37  ;;  %v2446_v5 = vld [vmem:[%s5257_s8 + $0x10] sm:$0xff] }
 0x46d   : > { %v2214_v41 = vadd.f32 %v2210_v53, %v2190_v15  ;;  %3216 = vmatprep.subr.bf16.mxu1 %v3215_v34  ;;  %v3219_v53 = vpack.c.bf16 %v2447_v28, %v2446_v5  ;;  %v2685_v15 = vld [vmem:[%s5256_s7] ss:$0 sm:$0xff] }
 0x46e   : > { %v2244_v18 = vpop.permute.xlu1 %2243  ;;  %3218 = vmatpush3.bf16.msra.mxu1 %v3215_v34 }
 0x46f   : > { %v2254_v59 = vadd.f32 %v2246_v27, %v2214_v41  ;;  %v2253_v47 = vadd.f32 %v2244_v18, %v2213_v2  ;;  %3220 = vmatprep.subr.bf16.mxu1 %v3219_v53 }
 0x471   : > { %2263 = vrot.lane.b32.xlu1 %v2253_v47, %s3643_s23  ;;  %2265 = vrot.lane.b32.xlu0 %v2254_v59, %s3643_s23 }
 0x472   : > { %3222 = vmatpush3.bf16.msra.mxu1 %v3219_v53 }
 0x476   : > { %v1280_v36 = vpop.permute.xlu1 %1279 }
 0x477   : > { %v1291_v22 = vmul.f32 %v1280_v36, %v5002_v49 }
 0x482   : > { %v1282_v26 = vpop.permute.xlu1 %1281 }
 0x483   : > { %v1292_v49 = vmul.f32 %v1282_v26, %v5027_v24 }
 0x486   : > { %v1284_v57 = vpop.permute.xlu1 %1283 }
 0x487   : > { %v1293_v24 = vmul.f32 %v1284_v57, %v5037_v58 }
 0x48e   : > { %v1286_v42 = vpop.permute.xlu1 %1285 }
 0x48f   : > { %v1294_v2 = vmul.f32 %v1286_v42, %v5050_v20 }
 0x495   : > { %v2260_v43 = vpop.permute.xlu1 %2259 }
 0x496   : > { %v2271_v61 = vmul.f32 %v2260_v43, %v5061_v35 }
 0x49e   : > { %v1770_v10 = vpop.permute.xlu0 %1769 }
 0x49f   : > { %v1781_v54 = vmul.f32 %v1770_v10, %v5079_v1 }
 0x4a1   : > { %v1785_v6 = vadd.f32 %v1781_v54, %v1291_v22 }
 0x4a3   : > { %v2275_v21 = vadd.f32 %v2271_v61, %v1785_v6 }
 0x4a5   : > { %v2681_v8 = vmul.f32 -1.442695, %v2275_v21 }
 0x4a7   : > { %3463 = vpow2.f32 %v2681_v8 }
 0x4aa   : > { %v1772_v4 = vpop.permute.xlu0 %1771 }
 0x4ab   : > { %v1782_v62 = vmul.f32 %v1772_v4, %v5099_v32 }
 0x4ad   : > { %v1786_v1 = vadd.f32 %v1782_v62, %v1292_v49 }
 0x4ae   : > { %v1774_v52 = vpop.permute.xlu0 %1773 }
 0x4af   : > { %v1783_v11 = vmul.f32 %v1774_v52, %v5106_v31 }
 0x4b1   : > { %v3464_v40 = vpop.eup %3463  ;;  %v1787_v7 = vadd.f32 %v1783_v11, %v1293_v24 }
 0x4b2   : > { %v2291_v48 = vadd.f32 1.0, %v3464_v40 }
 0x4b4   : > { %3465 = vrcp.f32 %v2291_v48 }
 0x4b6   : > { %v1776_v38 = vpop.permute.xlu0 %1775 }
 0x4b7   : > { %v1784_v9 = vmul.f32 %v1776_v38, %v5120_v14 }
 0x4b9   : > { %v1788_v46 = vadd.f32 %v1784_v9, %v1294_v2 }
 0x4be   : > { %v3466_v30 = vpop.eup %3465 }
 0x4bf   : > { %v2303_v45 = vmul.f32 %v3466_v30, %v2275_v21 }
 0x4c1   : > { %2995 = vmatprep.mubr.msk.f32.mxu0 %vm2318_vm9, %v2303_v45 }
 0x4c2   : > { %v2262_v35 = vpop.permute.xlu0 %2261 }
 0x4c3   : > { %v2272_v55 = vmul.f32 %v2262_v35, %v5131_v33 }
 0x4c5   : > { %v2276_v12 = vadd.f32 %v2272_v55, %v1786_v1  ;;  %v2694_v55 = vld [vmem:[%s5258_s9] ss:$0 sm:$0xff] }
 0x4c7   : > { %v2682_v44 = vmul.f32 -1.442695, %v2276_v12 }
 0x4c9   : > { %3467 = vpow2.f32 %v2682_v44 }
 0x4d3   : > { %v3468_v50 = vpop.eup %3467 }
 0x4d4   : > { %v2292_v17 = vadd.f32 1.0, %v3468_v50 }
 0x4d6   : > { %3469 = vrcp.f32 %v2292_v17 }
 0x4e0   : > { %v3470_v60 = vpop.eup %3469 }
 0x4e1   : > { %v2304_v32 = vmul.f32 %v3470_v60, %v2276_v12 }
 0x4e3   : > { %v2264_v25 = vpop.permute.xlu1 %2263  ;;  %2996 = vmatmul.mubr.msk.f32.vlgmr.msra.gmra.mrb[24].mxu0 %vm2318_vm9, %v2304_v32  ;;  %v2266_v33 = vpop.permute.xlu0 %2265 }
 0x4e4   : > { %v2273_v19 = vmul.f32 %v2264_v25, %v2253_v47  ;;  %v2274_v39 = vmul.f32 %v2266_v33, %v2254_v59 }
 0x4e6   : > { %v2277_v29 = vadd.f32 %v2273_v19, %v1787_v7  ;;  %v2278_v13 = vadd.f32 %v2274_v39, %v1788_v46 }
 0x4e8   : > { %v2683_v51 = vmul.f32 -1.442695, %v2277_v29  ;;  %v2684_v16 = vmul.f32 -1.442695, %v2278_v13 }
 0x4ea   : > { %3471 = vpow2.f32 %v2683_v51 }
 0x4eb   : > { %3473 = vpow2.f32 %v2684_v16 }
 0x4f4   : > { %v3472_v31 = vpop.eup %3471 }
 0x4f5   : > { %v3474_v14 = vpop.eup %3473  ;;  %v2293_v56 = vadd.f32 1.0, %v3472_v31 }
 0x4f6   : > { %v2294_v58 = vadd.f32 1.0, %v3474_v14 }
 0x4f7   : > { %3475 = vrcp.f32 %v2293_v56 }
 0x4f8   : > { %3477 = vrcp.f32 %v2294_v58 }
 0x501   : > { %v3476_v20 = vpop.eup %3475 }
 0x502   : > { %v3478_v3 = vpop.eup %3477  ;;  %v2305_v63 = vmul.f32 %v3476_v20, %v2277_v29 }
 0x503   : > { %v2306_v23 = vmul.f32 %v3478_v3, %v2278_v13 }
 0x504   : > { %2998 = vmatprep.mubr.msk.f32.mxu0 %vm2318_vm9, %v2305_v63 }
 0x505   : > { %2999 = vmatmul.mubr.msk.f32.gmra.mrb[26].mxu0 %vm2318_vm9, %v2306_v23 }
 0x5b6   : > { %v2997_v41 = vpop.f32.mrb[24].mxu0 }
 0x5b7   : > { %v2403_v27 = vadd.f32 %v2997_v41, %v2685_v15  ;;  %v2397_v18 = vpop.f32.mrb[25].mxu0 }
 0x5b8   : > { %v2398_v59 = vadd.f32 %v2685_v15, %v2397_v18 }
 0x5b9   : > { %v2691_v47 = vmul.f32 -1.442695, %v2403_v27 }
 0x5ba   : > { %v2690_v36 = vmul.f32 -1.442695, %v2398_v59 }
 0x5bb   : > { %3479 = vpow2.f32 %v2691_v47 }
 0x5bc   : > { %3481 = vpow2.f32 %v2690_v36 }
 0x5c5   : > { %v3480_v26 = vpop.eup %3479 }
 0x5c6   : > { %v3482_v57 = vpop.eup %3481  ;;  %v2429_v42 = vadd.f32 1.0, %v3480_v26 }
 0x5c7   : > { %v2428_v43 = vadd.f32 1.0, %v3482_v57 }
 0x5c8   : > { %3483 = vrcp.f32 %v2429_v42 }
 0x5c9   : > { %3485 = vrcp.f32 %v2428_v43 }
 0x5d2   : > { %v3484_v10 = vpop.eup %3483 }
 0x5d3   : > { %v3486_v22 = vpop.eup %3485  ;;  %v2441_v61 = vmul.f32 %v3484_v10, %v2403_v27 }
 0x5d4   : > { %v2440_v54 = vmul.f32 %v3486_v22, %v2398_v59 }
 0x5d6   : > { %3009 = vmatprep.mubr.msk.f32.mxu1 %vm2318_vm9, %v2440_v54 }
 0x5d7   : > { %3010 = vmatmul.mubr.msk.f32.vlgmr.msra.gmra.mrb[24].mxu1 %vm2318_vm9, %v2441_v61 }
 0x5d8   : > { %v3000_v6 = vpop.f32.mrb[26].mxu0 }
 0x5d9   : > { %v2413_v21 = vadd.f32 %v3000_v6, %v2685_v15  ;;  %v2407_v8 = vpop.f32.mrb[27].mxu0 }
 0x5da   : > { %v2408_v40 = vadd.f32 %v2685_v15, %v2407_v8 }
 0x5db   : > { %v2693_v48 = vmul.f32 -1.442695, %v2413_v21 }
 0x5dc   : > { %v2692_v4 = vmul.f32 -1.442695, %v2408_v40 }
 0x5dd   : > { %3487 = vpow2.f32 %v2693_v48 }
 0x5de   : > { %3489 = vpow2.f32 %v2692_v4 }
 0x5e7   : > { %v3488_v52 = vpop.eup %3487 }
 0x5e8   : > { %v3490_v30 = vpop.eup %3489  ;;  %v2431_v38 = vadd.f32 1.0, %v3488_v52 }
 0x5e9   : > { %v2430_v45 = vadd.f32 1.0, %v3490_v30 }
 0x5ea   : > { %3491 = vrcp.f32 %v2431_v38 }
 0x5eb   : > { %3493 = vrcp.f32 %v2430_v45 }
 0x5f4   : > { %v3492_v62 = vpop.eup %3491 }
 0x5f5   : > { %v3494_v49 = vpop.eup %3493  ;;  %v2443_v1 = vmul.f32 %v3492_v62, %v2413_v21 }
 0x5f6   : > { %v2442_v35 = vmul.f32 %v3494_v49, %v2408_v40 }
 0x5f8   : > { %3012 = vmatprep.mubr.msk.f32.mxu1 %vm2318_vm9, %v2442_v35 }
 0x5f9   : > { %3013 = vmatmul.mubr.msk.f32.gmra.mrb[26].mxu1 %vm2318_vm9, %v2443_v1 }
 0x6aa   : > { %v3011_v12 = vpop.f32.mrb[24].mxu1 }
 0x6ab   : > { %v2539_v44 = vadd.f32 %v3011_v12, %v2694_v55  ;;  %v2533_v50 = vpop.f32.mrb[25].mxu1 }
 0x6ac   : > { %v2534_v17 = vadd.f32 %v2694_v55, %v2533_v50 }
 0x6ad   : > { %2553 = vst [vmem:[%s409_s29 + $0x8] sm:$0xff] %v2539_v44 }
 0x6ae   : > { %2552 = vst [vmem:[%s409_s29] sm:$0xff] %v2534_v17 }
 0x6cc   : > { %v3014_v60 = vpop.f32.mrb[26].mxu1 }
 0x6cd   : > { %v2549_v11 = vadd.f32 %v3014_v60, %v2694_v55  ;;  %v2543_v9 = vpop.f32.mrb[27].mxu1 }
 0x6ce   : > { %v2544_v32 = vadd.f32 %v2694_v55, %v2543_v9 }
 0x6cf   : > { %2555 = vst [vmem:[%s409_s29 + $0x18] sm:$0xff] %v2549_v11 }
 0x6d0   : > { %2554 = vst [vmem:[%s409_s29 + $0x10] sm:$0xff] %v2544_v32 }
 0x6d1   : > { %3566 = shalt.err (!%p3563_p9)
}
 0x6d2   : > { %s3567_s19 = scalar_lea.hbm %s5205_s21, 512  ;;  %s3571_s29 = scalar_lea.hbm %s5259_s10, 1024 }
 0x6d3   : > { %p3568_p2 = scmp.ne.s32.totalorder %s5205_s21, %s3567_s19  ;;  %p3572_p1 = scmp.lt.u32.totalorder %s5205_s21, %s5259_s10 }
 0x6d4   : > { %p3573_p11 = scmp.lt.u32.totalorder %s3571_s29, %s3567_s19  ;;  %p3575_p6 = scmp.lt.u32.totalorder %s3567_s19, %s5205_s21 }
 0x6d5   : > { %p3569_p0 = pnand %p3568_p2, %p3793_p12 }
 0x6d6   : > { %p3574_p4 = por %p3573_p11, %p3572_p1 }
 0x6d7   : > { %p3570_p5 = pneg %p3569_p0 }
 0x6d8   : > { %p3576_p8 = por %p3575_p6, %p3574_p4 }
 0x6da   : > { %p3577_p10 = pnand %p3576_p8, %p3570_p5 }
 0x6dc   : > { %3580 = shalt.err (!%p3577_p10)
}
 0x6dd   : > { %s3645_s23 = smov 128   ;;  %s3646_s26 = smov 8  }
 0x6de   : > { %3229 = dma.vmem_to_hbm [thread:$0]  (%p3793_p12), %s5200_s11, 512, %s5205_s21, %s2557_s30, %s3645_s23, %s3645_s23, %s3646_s26  }
 0x6df PF: > { %s5403_s17 = sld [smem:[#allocation11_spill]]  ;;  %s5404_s27 = sld [smem:[#allocation12_spill]] }
 0x6e0   : > { %p5406_p3 = scmp.ge.s32.totalorder %s3623_s16, 2 }
 0x6e5   : > { %s2585_s28 = sand.u32 1, %s5403_s17   ;;  %p5405_p13 = scmp.ne.s32.totalorder %s5404_s27, 0 }
 0x6e6   : > { %s2586_s19 = scalar_lea.sflag [#allocation4], %s2585_s28 }
 0x6e7   : > { %p3240_p7 = pnand %p5406_p3, %p5405_p13 }
 0x6e9   : > { %3606 = dma.done.wait (!%p3240_p7), %s2586_s19, 512  }
 0x6ea   : > { %3608 = vsyncadd (!%p3240_p7), %s2586_s19, 4294966784  ;;  %s5407_s16 = sld [smem:[#allocation13_spill]]  ;;  %s5408_s13 = smov %s3615_s14 }
 0x6eb   : > { %s5409_s14 = smov %s3619_s15  ;;  %s5410_s15 = smov %s3789_s25 }
 0x6f0   : > { %p24_p9 = scmp.ge.s32.totalorder %s5407_s16, 4  }
 0x6f2   :  { %26 = sbr.rel (!%p24_p9) target bundleno = 6 (0x6), region = 113 }
 0x6f9   :  { %2591 = vsyncpa [#allocation3], 1 }
 0x6fa   :  { %2593 = vsyncpa [#allocation3 + $0x1], 1 }
 0x6fb   :  { %2594 = vsyncpa [#allocation6], 1 }
 0x6fc   :  { %2596 = vsyncpa [#allocation6 + $0x1], 1 }
 0x6fd   :  { %2597 = vsyncpa [#allocation4], 1 }
 0x6fe   :  { %2599 = vsyncpa [#allocation4 + $0x1], 1 }

</bundles_post_ra>
